<compile_context>
chip_gen: v7x
topology: tpu7x:2x2x1
jax: 0.10.0
libtpu: 0.0.40
codegen_flags: <defaults>
</compile_context>

<pallas_src>
import functools

import jax
import jax.numpy as jnp
from jax.experimental import pallas as pl
from jax.experimental.pallas import tpu as pltpu

HIDDEN = 64
D1, D2 = 32, 16
T_CHUNK_MAX = 16    # timesteps processed per grid step (inner unrolled loop)
B_BLOCK_MAX = 64    # max batch rows per batch grid block (vreg-pressure cap)


def _pick_matmul_dtype():
    """bf16 MXU operands on bf16-native chips (v6e/v7x); f32 otherwise."""
    try:
        kind = jax.devices()[0].device_kind.lower()
    except Exception:
        return jnp.float32
    if ("v6" in kind) or ("v7" in kind):
        return jnp.bfloat16
    return jnp.float32


MATMUL_DTYPE = _pick_matmul_dtype()


def _reorder_ifog(w):
    """PyTorch LSTM gate order (i, f, g, o) -> kernel order (i, f, o, g), axis 0."""
    H = HIDDEN
    return jnp.concatenate([w[: 2 * H], w[3 * H: 4 * H], w[2 * H: 3 * H]], axis=0)


def _gates_to_hc(gates, c):
    """gates: (B, 4H) in (i, f, o, g) order; sigmoid only over the first 3H lanes."""
    H = HIDDEN
    sg = jax.nn.sigmoid(gates[:, : 3 * H])
    i = sg[:, 0:H]
    f = sg[:, H: 2 * H]
    o = sg[:, 2 * H: 3 * H]
    g = jnp.tanh(gates[:, 3 * H:])
    c_new = f * c + i * g
    h_new = o * jnp.tanh(c_new)
    return h_new, c_new


def _disc_kernel(
    x_ref,                                   # (Tt, Bb, F_pad) raw inputs (+ ones col)
    wih1_ref,                                # (F_pad, 4H)  [W_ih0^T ; b1 ; 0]
    whh1_ref,                                # (2H, 4H)     [W_hh0^T ; 0]
    w2s_ref, b2_ref,                         # (2H, 4H) [W_ih1^T ; W_hh1^T], (1, 4H)
    wd1_ref, bd1_ref, wd2_ref, bd2_ref,      # dense1 / dense2 (f32)
    wc_ref, bc_ref,                          # classifier (f32)
    out_ref,                                 # (Bb, 1)
    cat_s, h2_s, c1_s, c2_s,                 # VMEM scratch: (Bb,2H),(Bb,H),(Bb,H),(Bb,H)
    *, tt, rem,
):
    tc = pl.program_id(1)                    # time-chunk index ("arbitrary", innermost)
    nt = pl.num_programs(1)
    H = HIDDEN
    Bb = h2_s.shape[0]
    mm_dt = whh1_ref.dtype

    @pl.when(tc == 0)
    def _():
        cat_s[...] = jnp.zeros_like(cat_s)
        h2_s[...] = jnp.zeros_like(h2_s)
        c1_s[...] = jnp.zeros_like(c1_s)
        c2_s[...] = jnp.zeros_like(c2_s)

    # Hoisted once per chunk (avoid a broadcast_in_dim per unrolled iteration).
    b2b = jnp.broadcast_to(b2_ref[...], (Bb, 4 * H))

    def step(i, catv, h2v, c1v, c2v):
        # Layer 1: input projection (b1 folded via the ones column) is off the
        # serial h/c critical path; recurrent dot uses the packed (Bb,128) cat
        # from the previous step (zero rows of whh1 kill the stale h2 half).
        xg = jnp.dot(x_ref[i], wih1_ref[...], preferred_element_type=jnp.float32)
        gates1 = xg + jnp.dot(catv.astype(mm_dt), whh1_ref[...],
                              preferred_element_type=jnp.float32)
        h1n, c1v = _gates_to_hc(gates1, c1v)

        # Packed state [h1(t) | h2(t-1)]: layer-2 input now, layer-1 input at t+1.
        catv = jnp.concatenate([h1n, h2v], axis=-1)
        gates2 = jnp.dot(catv.astype(mm_dt), w2s_ref[...],
                         preferred_element_type=jnp.float32) + b2b
        h2v, c2v = _gates_to_hc(gates2, c2v)
        return catv, h2v, c1v, c2v

    catv, h2v, c1v, c2v = cat_s[...], h2_s[...], c1_s[...], c2_s[...]

    # Unconditional steps: all `tt` when the time axis divides evenly, else the
    # first `rem` (only the last chunk has padded timesteps).
    n_uncond = rem if rem else tt
    for i in range(n_uncond):                # python-unrolled: LLO sees the chunk
        catv, h2v, c1v, c2v = step(i, catv, h2v, c1v, c2v)
    cat_s[...], h2_s[...], c1_s[...], c2_s[...] = catv, h2v, c1v, c2v

    if rem:
        # Remaining steps run only on non-final chunks (padded tail skipped,
        # no per-step jnp.where freezes).
        @pl.when(tc < nt - 1)
        def _():
            cv, hv, c1x, c2x = catv, h2v, c1v, c2v
            for i in range(rem, tt):
                cv, hv, c1x, c2x = step(i, cv, hv, c1x, c2x)
            cat_s[...], h2_s[...], c1_s[...], c2_s[...] = cv, hv, c1x, c2x

    # MLP head on h_n[-1], once per batch block at the final time chunk.
    @pl.when(tc == nt - 1)
    def _():
        h2f = h2_s[...]
        z1 = jnp.maximum(
            jnp.dot(h2f, wd1_ref[...], preferred_element_type=jnp.float32)
            + bd1_ref[...], 0.0)
        z2 = jnp.maximum(
            jnp.dot(z1, wd2_ref[...], preferred_element_type=jnp.float32)
            + bd2_ref[...], 0.0)
        out_ref[...] = (
            jnp.dot(z2, wc_ref[...], preferred_element_type=jnp.float32)
            + bc_ref[...]
        )


def init_params(key, input_size):
    """Deterministic synthetic parameters with PyTorch-shaped tensors."""
    F = input_size + 2
    H = HIDDEN
    ks = jax.random.split(key, 16)
    u = lambda k, shape, s: jax.random.uniform(k, shape, jnp.float32, -s, s)
    s_l = 1.0 / jnp.sqrt(H)
    params = dict(
        # nn.LSTM layer 0
        w_ih0=u(ks[0], (4 * H, F), s_l), w_hh0=u(ks[1], (4 * H, H), s_l),
        b_ih0=u(ks[2], (4 * H,), s_l),   b_hh0=u(ks[3], (4 * H,), s_l),
        # nn.LSTM layer 1
        w_ih1=u(ks[4], (4 * H, H), s_l), w_hh1=u(ks[5], (4 * H, H), s_l),
        b_ih1=u(ks[6], (4 * H,), s_l),   b_hh1=u(ks[7], (4 * H,), s_l),
        # dense1: 64 -> 32
        wd1=u(ks[8], (D1, H), 1.0 / jnp.sqrt(H)),  bd1=u(ks[9], (D1,), 1.0 / jnp.sqrt(H)),
        # dense2: 32 -> 16
        wd2=u(ks[10], (D2, D1), 1.0 / jnp.sqrt(D1)), bd2=u(ks[11], (D2,), 1.0 / jnp.sqrt(D1)),
        # classifier: 16 -> 1
        wc=u(ks[12], (1, D2), 1.0 / jnp.sqrt(D2)),   bc=u(ks[13], (1,), 1.0 / jnp.sqrt(D2)),
    )
    return params


def _round_up(x, m):
    return ((x + m - 1) // m) * m


@jax.jit
def discriminator_forward(params, beatmap_features, position_output):
    H = HIDDEN
    mm_dt = MATMUL_DTYPE

    x = jnp.concatenate([beatmap_features, position_output], axis=-1)  # (B, T, F)
    x = x.astype(jnp.float32)
    B, T, F = x.shape
    assert T >= 1, "sequence length must be >= 1"

    # ---- time / batch tiling ----
    Tt = min(T, T_CHUNK_MAX)
    nt = -(-T // Tt)
    T_pad = nt * Tt
    rem = T % Tt

    Bb = min(_round_up(B, 8), B_BLOCK_MAX)
    if B > 8:
        # Prefer >= 2 batch blocks so the "parallel" axis spans both v7x TCs.
        Bb = min(Bb, _round_up(-(-B // 2), 8))
    nb = -(-B // Bb)
    B_pad = nb * Bb

    # ---- input prep: (T, B, F) + ones column (folds b1), pad to F_pad lanes ----
    x_tbf = jnp.transpose(x, (1, 0, 2))                                # (T, B, F)
    x_aug = jnp.concatenate([x_tbf, jnp.ones((T, B, 1), jnp.float32)], axis=-1)
    F_aug = F + 1
    F_pad = _round_up(F_aug, 8)
    x_pad = jnp.pad(
        x_aug, ((0, T_pad - T), (0, B_pad - B), (0, F_pad - F_aug))
    ).astype(mm_dt)                                                    # (T_pad, B_pad, F_pad)

    # ---- weight prep (plain JAX, outside the recurrence) ----
    w_ih0 = _reorder_ifog(params["w_ih0"])                             # (4H, F)   i,f,o,g
    w_hh0 = _reorder_ifog(params["w_hh0"])                             # (4H, H)
    b1 = _reorder_ifog(params["b_ih0"] + params["b_hh0"])              # (4H,)
    w_ih1 = _reorder_ifog(params["w_ih1"])                             # (4H, H)
    w_hh1 = _reorder_ifog(params["w_hh1"])                             # (4H, H)
    b2 = _reorder_ifog(params["b_ih1"] + params["b_hh1"]).reshape(1, 4 * H)

    # Layer-1 input weight with b1 as the ones-column row, padded to F_pad rows.
    wih1_aug = jnp.concatenate(
        [w_ih0.T, b1.reshape(1, 4 * H),
         jnp.zeros((F_pad - F_aug, 4 * H), jnp.float32)], axis=0).astype(mm_dt)
    # Layer-1 recurrent weight padded to K=2H (zero rows kill the h2 half of cat).
    whh1p = jnp.concatenate(
        [w_hh0.T, jnp.zeros((H, 4 * H), jnp.float32)], axis=0).astype(mm_dt)
    # Layer-2 fused input+recurrent weight: [W_ih1^T ; W_hh1^T]  (2H, 4H).
    w2s = jnp.concatenate([w_ih1.T, w_hh1.T], axis=0).astype(mm_dt)

    wd1_t = params["wd1"].T                                            # (64, 32)
    bd1 = params["bd1"].reshape(1, D1)
    wd2_t = params["wd2"].T                                            # (32, 16)
    bd2 = params["bd2"].reshape(1, D2)
    wc_t = params["wc"].T                                              # (16, 1)
    bc = params["bc"].reshape(1, 1)

    full = lambda a: pl.BlockSpec(a.shape, lambda b, t: (0,) * a.ndim)
    kernel = functools.partial(_disc_kernel, tt=Tt, rem=rem)

    out = pl.pallas_call(
        kernel,
        out_shape=jax.ShapeDtypeStruct((B_pad, 1), jnp.float32),
        grid_spec=pltpu.PrefetchScalarGridSpec(
            num_scalar_prefetch=0,
            grid=(nb, nt),                                             # (batch blocks, time chunks)
            in_specs=[
                pl.BlockSpec((Tt, Bb, F_pad), lambda b, t: (t, b, 0)),  # raw inputs
                full(wih1_aug), full(whh1p),
                full(w2s), full(b2),
                full(wd1_t), full(bd1), full(wd2_t), full(bd2),
                full(wc_t), full(bc),
            ],
            out_specs=pl.BlockSpec((Bb, 1), lambda b, t: (b, 0)),
            scratch_shapes=[
                pltpu.VMEM((Bb, 2 * H), jnp.float32),  # cat = [h1 | h2(stale)]
                pltpu.VMEM((Bb, H), jnp.float32),      # h2
                pltpu.VMEM((Bb, H), jnp.float32),      # c1
                pltpu.VMEM((Bb, H), jnp.float32),      # c2
            ],
        ),
        compiler_params=pltpu.CompilerParams(
            dimension_semantics=("parallel", "arbitrary"),
        ),
    )(x_pad, wih1_aug, whh1p, w2s, b2, wd1_t, bd1, wd2_t, bd2, wc_t, bc)

    return out[:B]  # strip batch padding -> (B, 1)


def _reference_forward(params, beatmap_features, position_output):
    """Pure-JAX reference matching PyTorch LSTM/Linear semantics (eval mode)."""
    x = jnp.concatenate([beatmap_features, position_output], axis=-1).astype(jnp.float32)
    B, T, F = x.shape
    H = HIDDEN

    def cell(x_in, h, c, w_ih, w_hh, b_ih, b_hh):
        gates = x_in @ w_ih.T + b_ih + h @ w_hh.T + b_hh
        i, f, g, o = jnp.split(gates, 4, axis=-1)
        c_new = jax.nn.sigmoid(f) * c + jax.nn.sigmoid(i) * jnp.tanh(g)
        h_new = jax.nn.sigmoid(o) * jnp.tanh(c_new)
        return h_new, c_new

    h1 = c1 = h2 = c2 = jnp.zeros((B, H), jnp.float32)
    for t in range(T):
        h1, c1 = cell(x[:, t], h1, c1, params["w_ih0"], params["w_hh0"],
                      params["b_ih0"], params["b_hh0"])
        h2, c2 = cell(h1, h2, c2, params["w_ih1"], params["w_hh1"],
                      params["b_ih1"], params["b_hh1"])
    z = jax.nn.relu(h2 @ params["wd1"].T + params["bd1"])
    z = jax.nn.relu(z @ params["wd2"].T + params["bd2"])
    return z @ params["wc"].T + params["bc"]


if __name__ == "__main__":
    key = jax.random.PRNGKey(0)
    k_p, k_b, k_pos = jax.random.split(key, 3)

    B, T, input_size = 2, 8, 4
    beatmap_features = jax.random.normal(k_b, (B, T, input_size), jnp.float32)
    position_output = jax.random.normal(k_pos, (B, T, 2), jnp.float32)

    params = init_params(k_p, input_size)

    out = discriminator_forward(params, beatmap_features, position_output)
    out = jax.block_until_ready(out)

    ref = _reference_forward(params, beatmap_features, position_output)
    # bf16 MXU operands (v6e/v7x) need a relaxed tolerance vs. the f32 reference.
    tol = 3e-2 if MATMUL_DTYPE == jnp.bfloat16 else 1e-4
    assert out.shape == (B, 1), out.shape
    assert jnp.allclose(out, ref, atol=tol, rtol=tol), (out, ref)

    print("KERNEL_OK")
</pallas_src>

<mosaic_0001>
module attributes {stable_mosaic.version = 11 : i64} {
  func.func @_disc_kernel(%arg0: i32, %arg1: i32, %arg2: memref<8x8x8xf32, #tpu.memory_space<vmem>>, %arg3: memref<8x256xf32, #tpu.memory_space<vmem>>, %arg4: memref<128x256xf32, #tpu.memory_space<vmem>>, %arg5: memref<128x256xf32, #tpu.memory_space<vmem>>, %arg6: memref<1x256xf32, #tpu.memory_space<vmem>>, %arg7: memref<64x32xf32, #tpu.memory_space<vmem>>, %arg8: memref<1x32xf32, #tpu.memory_space<vmem>>, %arg9: memref<32x16xf32, #tpu.memory_space<vmem>>, %arg10: memref<1x16xf32, #tpu.memory_space<vmem>>, %arg11: memref<16x1xf32, #tpu.memory_space<vmem>>, %arg12: memref<1x1xf32, #tpu.memory_space<vmem>>, %arg13: memref<8x1xf32, #tpu.memory_space<vmem>>, %arg14: memref<8x128xf32, #tpu.memory_space<vmem>>, %arg15: memref<8x64xf32, #tpu.memory_space<vmem>>, %arg16: memref<8x64xf32, #tpu.memory_space<vmem>>, %arg17: memref<8x64xf32, #tpu.memory_space<vmem>>) attributes {dimension_semantics = [#tpu.dimension_semantics<parallel>, #tpu.dimension_semantics<arbitrary>], iteration_bounds = array<i64: 1, 1>, scalar_prefetch = 0 : i64, scratch_operands = 4 : i64, tpu.core_type = #tpu.core_type<tc>, window_params = [{transform_indices = @transform_0, window_bounds = array<i64: 8, 8, 8>}, {pipeline_mode = #tpu.pipeline_mode<synchronous>, transform_indices = @transform_1, window_bounds = array<i64: 8, 256>}, {pipeline_mode = #tpu.pipeline_mode<synchronous>, transform_indices = @transform_2, window_bounds = array<i64: 128, 256>}, {pipeline_mode = #tpu.pipeline_mode<synchronous>, transform_indices = @transform_3, window_bounds = array<i64: 128, 256>}, {pipeline_mode = #tpu.pipeline_mode<synchronous>, transform_indices = @transform_4, window_bounds = array<i64: 1, 256>}, {pipeline_mode = #tpu.pipeline_mode<synchronous>, transform_indices = @transform_5, window_bounds = array<i64: 64, 32>}, {pipeline_mode = #tpu.pipeline_mode<synchronous>, transform_indices = @transform_6, window_bounds = array<i64: 1, 32>}, {pipeline_mode = #tpu.pipeline_mode<synchronous>, transform_indices = @transform_7, window_bounds = array<i64: 32, 16>}, {pipeline_mode = #tpu.pipeline_mode<synchronous>, transform_indices = @transform_8, window_bounds = array<i64: 1, 16>}, {pipeline_mode = #tpu.pipeline_mode<synchronous>, transform_indices = @transform_9, window_bounds = array<i64: 16, 1>}, {pipeline_mode = #tpu.pipeline_mode<synchronous>, transform_indices = @transform_10, window_bounds = array<i64: 1, 1>}, {transform_indices = @transform_11, window_bounds = array<i64: 8, 1>}]} {
    %c0_i32 = arith.constant 0 : i32
    %0 = arith.cmpi eq, %arg1, %c0_i32 : i32
    %1 = arith.extui %0 : i1 to i32
    %c0_i32_0 = arith.constant 0 : i32
    %2 = arith.cmpi ne, %1, %c0_i32_0 : i32
    scf.if %2 {
      %cst_124 = arith.constant 0.000000e+00 : f32
      %361 = vector.broadcast %cst_124 : f32 to vector<8x128xf32>
      %c0_125 = arith.constant 0 : index
      %c0_126 = arith.constant 0 : index
      %362 = vector.load %arg14[%c0_125, %c0_126] : memref<8x128xf32, #tpu.memory_space<vmem>>, vector<8x128xf32>
      tpu.vector_store %arg14[%c0_125, %c0_126], %361 {strides = array<i32>} : memref<8x128xf32, #tpu.memory_space<vmem>>, vector<8x128xf32>,
      %cst_127 = arith.constant 0.000000e+00 : f32
      %363 = vector.broadcast %cst_127 : f32 to vector<8x64xf32>
      %c0_128 = arith.constant 0 : index
      %c0_129 = arith.constant 0 : index
      %364 = vector.load %arg15[%c0_128, %c0_129] : memref<8x64xf32, #tpu.memory_space<vmem>>, vector<8x64xf32>
      tpu.vector_store %arg15[%c0_128, %c0_129], %363 {strides = array<i32>} : memref<8x64xf32, #tpu.memory_space<vmem>>, vector<8x64xf32>,
      %cst_130 = arith.constant 0.000000e+00 : f32
      %365 = vector.broadcast %cst_130 : f32 to vector<8x64xf32>
      %c0_131 = arith.constant 0 : index
      %c0_132 = arith.constant 0 : index
      %366 = vector.load %arg16[%c0_131, %c0_132] : memref<8x64xf32, #tpu.memory_space<vmem>>, vector<8x64xf32>
      tpu.vector_store %arg16[%c0_131, %c0_132], %365 {strides = array<i32>} : memref<8x64xf32, #tpu.memory_space<vmem>>, vector<8x64xf32>,
      %cst_133 = arith.constant 0.000000e+00 : f32
      %367 = vector.broadcast %cst_133 : f32 to vector<8x64xf32>
      %c0_134 = arith.constant 0 : index
      %c0_135 = arith.constant 0 : index
      %368 = vector.load %arg17[%c0_134, %c0_135] : memref<8x64xf32, #tpu.memory_space<vmem>>, vector<8x64xf32>
      tpu.vector_store %arg17[%c0_134, %c0_135], %367 {strides = array<i32>} : memref<8x64xf32, #tpu.memory_space<vmem>>, vector<8x64xf32>,
    } else {
    }
    %c0 = arith.constant 0 : index
    %c0_1 = arith.constant 0 : index
    %3 = vector.load %arg6[%c0, %c0_1] : memref<1x256xf32, #tpu.memory_space<vmem>>, vector<1x256xf32>
    %4 = vector.shape_cast %3 : vector<1x256xf32> to vector<1x256xf32>
    %5 = vector.broadcast %4 : vector<1x256xf32> to vector<8x256xf32>
    %c0_2 = arith.constant 0 : index
    %c0_3 = arith.constant 0 : index
    %6 = vector.load %arg14[%c0_2, %c0_3] : memref<8x128xf32, #tpu.memory_space<vmem>>, vector<8x128xf32>
    %c0_4 = arith.constant 0 : index
    %c0_5 = arith.constant 0 : index
    %7 = vector.load %arg15[%c0_4, %c0_5] : memref<8x64xf32, #tpu.memory_space<vmem>>, vector<8x64xf32>
    %c0_6 = arith.constant 0 : index
    %c0_7 = arith.constant 0 : index
    %8 = vector.load %arg16[%c0_6, %c0_7] : memref<8x64xf32, #tpu.memory_space<vmem>>, vector<8x64xf32>
    %c0_8 = arith.constant 0 : index
    %c0_9 = arith.constant 0 : index
    %9 = vector.load %arg17[%c0_8, %c0_9] : memref<8x64xf32, #tpu.memory_space<vmem>>, vector<8x64xf32>
    %c0_10 = arith.constant 0 : index
    %c0_11 = arith.constant 0 : index
    %c0_12 = arith.constant 0 : index
    %10 = vector.load %arg2[%c0_10, %c0_11, %c0_12] : memref<8x8x8xf32, #tpu.memory_space<vmem>>, vector<1x8x8xf32>
    %11 = vector.shape_cast %10 : vector<1x8x8xf32> to vector<8x8xf32>
    %c0_13 = arith.constant 0 : index
    %c0_14 = arith.constant 0 : index
    %12 = vector.load %arg3[%c0_13, %c0_14] : memref<8x256xf32, #tpu.memory_space<vmem>>, vector<8x256xf32>
    %cst = arith.constant dense<0.000000e+00> : vector<8x256xf32>
    %13 = tpu.matmul %11, %12, %cst {dimension_numbers = #tpu.dot_dimension_numbers<[1], [0], [0], [1], [0, 0, 1, 1], [], []>} : vector<8x8xf32>, vector<8x256xf32>, vector<8x256xf32> -> vector<8x256xf32>
    %c0_15 = arith.constant 0 : index
    %c0_16 = arith.constant 0 : index
    %14 = vector.load %arg4[%c0_15, %c0_16] : memref<128x256xf32, #tpu.memory_space<vmem>>, vector<128x256xf32>
    %cst_17 = arith.constant dense<0.000000e+00> : vector<8x256xf32>
    %15 = tpu.matmul %6, %14, %cst_17 {dimension_numbers = #tpu.dot_dimension_numbers<[1], [0], [0], [1], [0, 0, 1, 1], [], []>} : vector<8x128xf32>, vector<128x256xf32>, vector<8x256xf32> -> vector<8x256xf32>
    %16 = arith.addf %13, %15 : vector<8x256xf32>
    %17 = vector.extract_strided_slice %16 {offsets = [0, 0], sizes = [8, 192], strides = [1, 1]} : vector<8x256xf32> to vector<8x192xf32>
    %18 = arith.negf %17 : vector<8x192xf32>
    %19 = math.exp %18 : vector<8x192xf32>
    %cst_18 = arith.constant 1.000000e+00 : f32
    %20 = vector.broadcast %cst_18 : f32 to vector<8x192xf32>
    %21 = arith.addf %20, %19 : vector<8x192xf32>
    %22 = arith.divf %20, %21 : vector<8x192xf32>
    %23 = vector.extract_strided_slice %22 {offsets = [0, 0], sizes = [8, 64], strides = [1, 1]} : vector<8x192xf32> to vector<8x64xf32>
    %24 = vector.extract_strided_slice %22 {offsets = [0, 64], sizes = [8, 64], strides = [1, 1]} : vector<8x192xf32> to vector<8x64xf32>
    %25 = vector.extract_strided_slice %22 {offsets = [0, 128], sizes = [8, 64], strides = [1, 1]} : vector<8x192xf32> to vector<8x64xf32>
    %26 = vector.extract_strided_slice %16 {offsets = [0, 192], sizes = [8, 64], strides = [1, 1]} : vector<8x256xf32> to vector<8x64xf32>
    %27 = math.tanh %26 : vector<8x64xf32>
    %28 = arith.mulf %24, %8 : vector<8x64xf32>
    %29 = arith.mulf %23, %27 : vector<8x64xf32>
    %30 = arith.addf %28, %29 : vector<8x64xf32>
    %31 = math.tanh %30 : vector<8x64xf32>
    %32 = arith.mulf %25, %31 : vector<8x64xf32>
    %33 = tpu.concatenate %32, %7 in 1 : vector<8x64xf32>, vector<8x64xf32> -> vector<8x128xf32>
    %c0_19 = arith.constant 0 : index
    %c0_20 = arith.constant 0 : index
    %34 = vector.load %arg5[%c0_19, %c0_20] : memref<128x256xf32, #tpu.memory_space<vmem>>, vector<128x256xf32>
    %cst_21 = arith.constant dense<0.000000e+00> : vector<8x256xf32>
    %35 = tpu.matmul %33, %34, %cst_21 {dimension_numbers = #tpu.dot_dimension_numbers<[1], [0], [0], [1], [0, 0, 1, 1], [], []>} : vector<8x128xf32>, vector<128x256xf32>, vector<8x256xf32> -> vector<8x256xf32>
    %36 = arith.addf %35, %5 : vector<8x256xf32>
    %37 = vector.extract_strided_slice %36 {offsets = [0, 0], sizes = [8, 192], strides = [1, 1]} : vector<8x256xf32> to vector<8x192xf32>
    %38 = arith.negf %37 : vector<8x192xf32>
    %39 = math.exp %38 : vector<8x192xf32>
    %cst_22 = arith.constant 1.000000e+00 : f32
    %40 = vector.broadcast %cst_22 : f32 to vector<8x192xf32>
    %41 = arith.addf %40, %39 : vector<8x192xf32>
    %42 = arith.divf %40, %41 : vector<8x192xf32>
    %43 = vector.extract_strided_slice %42 {offsets = [0, 0], sizes = [8, 64], strides = [1, 1]} : vector<8x192xf32> to vector<8x64xf32>
    %44 = vector.extract_strided_slice %42 {offsets = [0, 64], sizes = [8, 64], strides = [1, 1]} : vector<8x192xf32> to vector<8x64xf32>
    %45 = vector.extract_strided_slice %42 {offsets = [0, 128], sizes = [8, 64], strides = [1, 1]} : vector<8x192xf32> to vector<8x64xf32>
    %46 = vector.extract_strided_slice %36 {offsets = [0, 192], sizes = [8, 64], strides = [1, 1]} : vector<8x256xf32> to vector<8x64xf32>
    %47 = math.tanh %46 : vector<8x64xf32>
    %48 = arith.mulf %44, %9 : vector<8x64xf32>
    %49 = arith.mulf %43, %47 : vector<8x64xf32>
    %50 = arith.addf %48, %49 : vector<8x64xf32>
    %51 = math.tanh %50 : vector<8x64xf32>
    %52 = arith.mulf %45, %51 : vector<8x64xf32>
    %c1 = arith.constant 1 : index
    %c0_23 = arith.constant 0 : index
    %c0_24 = arith.constant 0 : index
    %53 = vector.load %arg2[%c1, %c0_23, %c0_24] : memref<8x8x8xf32, #tpu.memory_space<vmem>>, vector<1x8x8xf32>
    %54 = vector.shape_cast %53 : vector<1x8x8xf32> to vector<8x8xf32>
    %c0_25 = arith.constant 0 : index
    %c0_26 = arith.constant 0 : index
    %55 = vector.load %arg3[%c0_25, %c0_26] : memref<8x256xf32, #tpu.memory_space<vmem>>, vector<8x256xf32>
    %cst_27 = arith.constant dense<0.000000e+00> : vector<8x256xf32>
    %56 = tpu.matmul %54, %55, %cst_27 {dimension_numbers = #tpu.dot_dimension_numbers<[1], [0], [0], [1], [0, 0, 1, 1], [], []>} : vector<8x8xf32>, vector<8x256xf32>, vector<8x256xf32> -> vector<8x256xf32>
    %c0_28 = arith.constant 0 : index
    %c0_29 = arith.constant 0 : index
    %57 = vector.load %arg4[%c0_28, %c0_29] : memref<128x256xf32, #tpu.memory_space<vmem>>, vector<128x256xf32>
    %cst_30 = arith.constant dense<0.000000e+00> : vector<8x256xf32>
    %58 = tpu.matmul %33, %57, %cst_30 {dimension_numbers = #tpu.dot_dimension_numbers<[1], [0], [0], [1], [0, 0, 1, 1], [], []>} : vector<8x128xf32>, vector<128x256xf32>, vector<8x256xf32> -> vector<8x256xf32>
    %59 = arith.addf %56, %58 : vector<8x256xf32>
    %60 = vector.extract_strided_slice %59 {offsets = [0, 0], sizes = [8, 192], strides = [1, 1]} : vector<8x256xf32> to vector<8x192xf32>
    %61 = arith.negf %60 : vector<8x192xf32>
    %62 = math.exp %61 : vector<8x192xf32>
    %cst_31 = arith.constant 1.000000e+00 : f32
    %63 = vector.broadcast %cst_31 : f32 to vector<8x192xf32>
    %64 = arith.addf %63, %62 : vector<8x192xf32>
    %65 = arith.divf %63, %64 : vector<8x192xf32>
    %66 = vector.extract_strided_slice %65 {offsets = [0, 0], sizes = [8, 64], strides = [1, 1]} : vector<8x192xf32> to vector<8x64xf32>
    %67 = vector.extract_strided_slice %65 {offsets = [0, 64], sizes = [8, 64], strides = [1, 1]} : vector<8x192xf32> to vector<8x64xf32>
    %68 = vector.extract_strided_slice %65 {offsets = [0, 128], sizes = [8, 64], strides = [1, 1]} : vector<8x192xf32> to vector<8x64xf32>
    %69 = vector.extract_strided_slice %59 {offsets = [0, 192], sizes = [8, 64], strides = [1, 1]} : vector<8x256xf32> to vector<8x64xf32>
    %70 = math.tanh %69 : vector<8x64xf32>
    %71 = arith.mulf %67, %30 : vector<8x64xf32>
    %72 = arith.mulf %66, %70 : vector<8x64xf32>
    %73 = arith.addf %71, %72 : vector<8x64xf32>
    %74 = math.tanh %73 : vector<8x64xf32>
    %75 = arith.mulf %68, %74 : vector<8x64xf32>
    %76 = tpu.concatenate %75, %52 in 1 : vector<8x64xf32>, vector<8x64xf32> -> vector<8x128xf32>
    %c0_32 = arith.constant 0 : index
    %c0_33 = arith.constant 0 : index
    %77 = vector.load %arg5[%c0_32, %c0_33] : memref<128x256xf32, #tpu.memory_space<vmem>>, vector<128x256xf32>
    %cst_34 = arith.constant dense<0.000000e+00> : vector<8x256xf32>
    %78 = tpu.matmul %76, %77, %cst_34 {dimension_numbers = #tpu.dot_dimension_numbers<[1], [0], [0], [1], [0, 0, 1, 1], [], []>} : vector<8x128xf32>, vector<128x256xf32>, vector<8x256xf32> -> vector<8x256xf32>
    %79 = arith.addf %78, %5 : vector<8x256xf32>
    %80 = vector.extract_strided_slice %79 {offsets = [0, 0], sizes = [8, 192], strides = [1, 1]} : vector<8x256xf32> to vector<8x192xf32>
    %81 = arith.negf %80 : vector<8x192xf32>
    %82 = math.exp %81 : vector<8x192xf32>
    %cst_35 = arith.constant 1.000000e+00 : f32
    %83 = vector.broadcast %cst_35 : f32 to vector<8x192xf32>
    %84 = arith.addf %83, %82 : vector<8x192xf32>
    %85 = arith.divf %83, %84 : vector<8x192xf32>
    %86 = vector.extract_strided_slice %85 {offsets = [0, 0], sizes = [8, 64], strides = [1, 1]} : vector<8x192xf32> to vector<8x64xf32>
    %87 = vector.extract_strided_slice %85 {offsets = [0, 64], sizes = [8, 64], strides = [1, 1]} : vector<8x192xf32> to vector<8x64xf32>
    %88 = vector.extract_strided_slice %85 {offsets = [0, 128], sizes = [8, 64], strides = [1, 1]} : vector<8x192xf32> to vector<8x64xf32>
    %89 = vector.extract_strided_slice %79 {offsets = [0, 192], sizes = [8, 64], strides = [1, 1]} : vector<8x256xf32> to vector<8x64xf32>
    %90 = math.tanh %89 : vector<8x64xf32>
    %91 = arith.mulf %87, %50 : vector<8x64xf32>
    %92 = arith.mulf %86, %90 : vector<8x64xf32>
    %93 = arith.addf %91, %92 : vector<8x64xf32>
    %94 = math.tanh %93 : vector<8x64xf32>
    %95 = arith.mulf %88, %94 : vector<8x64xf32>
    %c2 = arith.constant 2 : index
    %c0_36 = arith.constant 0 : index
    %c0_37 = arith.constant 0 : index
    %96 = vector.load %arg2[%c2, %c0_36, %c0_37] : memref<8x8x8xf32, #tpu.memory_space<vmem>>, vector<1x8x8xf32>
    %97 = vector.shape_cast %96 : vector<1x8x8xf32> to vector<8x8xf32>
    %c0_38 = arith.constant 0 : index
    %c0_39 = arith.constant 0 : index
    %98 = vector.load %arg3[%c0_38, %c0_39] : memref<8x256xf32, #tpu.memory_space<vmem>>, vector<8x256xf32>
    %cst_40 = arith.constant dense<0.000000e+00> : vector<8x256xf32>
    %99 = tpu.matmul %97, %98, %cst_40 {dimension_numbers = #tpu.dot_dimension_numbers<[1], [0], [0], [1], [0, 0, 1, 1], [], []>} : vector<8x8xf32>, vector<8x256xf32>, vector<8x256xf32> -> vector<8x256xf32>
    %c0_41 = arith.constant 0 : index
    %c0_42 = arith.constant 0 : index
    %100 = vector.load %arg4[%c0_41, %c0_42] : memref<128x256xf32, #tpu.memory_space<vmem>>, vector<128x256xf32>
    %cst_43 = arith.constant dense<0.000000e+00> : vector<8x256xf32>
    %101 = tpu.matmul %76, %100, %cst_43 {dimension_numbers = #tpu.dot_dimension_numbers<[1], [0], [0], [1], [0, 0, 1, 1], [], []>} : vector<8x128xf32>, vector<128x256xf32>, vector<8x256xf32> -> vector<8x256xf32>
    %102 = arith.addf %99, %101 : vector<8x256xf32>
    %103 = vector.extract_strided_slice %102 {offsets = [0, 0], sizes = [8, 192], strides = [1, 1]} : vector<8x256xf32> to vector<8x192xf32>
    %104 = arith.negf %103 : vector<8x192xf32>
    %105 = math.exp %104 : vector<8x192xf32>
    %cst_44 = arith.constant 1.000000e+00 : f32
    %106 = vector.broadcast %cst_44 : f32 to vector<8x192xf32>
    %107 = arith.addf %106, %105 : vector<8x192xf32>
    %108 = arith.divf %106, %107 : vector<8x192xf32>
    %109 = vector.extract_strided_slice %108 {offsets = [0, 0], sizes = [8, 64], strides = [1, 1]} : vector<8x192xf32> to vector<8x64xf32>
    %110 = vector.extract_strided_slice %108 {offsets = [0, 64], sizes = [8, 64], strides = [1, 1]} : vector<8x192xf32> to vector<8x64xf32>
    %111 = vector.extract_strided_slice %108 {offsets = [0, 128], sizes = [8, 64], strides = [1, 1]} : vector<8x192xf32> to vector<8x64xf32>
    %112 = vector.extract_strided_slice %102 {offsets = [0, 192], sizes = [8, 64], strides = [1, 1]} : vector<8x256xf32> to vector<8x64xf32>
    %113 = math.tanh %112 : vector<8x64xf32>
    %114 = arith.mulf %110, %73 : vector<8x64xf32>
    %115 = arith.mulf %109, %113 : vector<8x64xf32>
    %116 = arith.addf %114, %115 : vector<8x64xf32>
    %117 = math.tanh %116 : vector<8x64xf32>
    %118 = arith.mulf %111, %117 : vector<8x64xf32>
    %119 = tpu.concatenate %118, %95 in 1 : vector<8x64xf32>, vector<8x64xf32> -> vector<8x128xf32>
    %c0_45 = arith.constant 0 : index
    %c0_46 = arith.constant 0 : index
    %120 = vector.load %arg5[%c0_45, %c0_46] : memref<128x256xf32, #tpu.memory_space<vmem>>, vector<128x256xf32>
    %cst_47 = arith.constant dense<0.000000e+00> : vector<8x256xf32>
    %121 = tpu.matmul %119, %120, %cst_47 {dimension_numbers = #tpu.dot_dimension_numbers<[1], [0], [0], [1], [0, 0, 1, 1], [], []>} : vector<8x128xf32>, vector<128x256xf32>, vector<8x256xf32> -> vector<8x256xf32>
    %122 = arith.addf %121, %5 : vector<8x256xf32>
    %123 = vector.extract_strided_slice %122 {offsets = [0, 0], sizes = [8, 192], strides = [1, 1]} : vector<8x256xf32> to vector<8x192xf32>
    %124 = arith.negf %123 : vector<8x192xf32>
    %125 = math.exp %124 : vector<8x192xf32>
    %cst_48 = arith.constant 1.000000e+00 : f32
    %126 = vector.broadcast %cst_48 : f32 to vector<8x192xf32>
    %127 = arith.addf %126, %125 : vector<8x192xf32>
    %128 = arith.divf %126, %127 : vector<8x192xf32>
    %129 = vector.extract_strided_slice %128 {offsets = [0, 0], sizes = [8, 64], strides = [1, 1]} : vector<8x192xf32> to vector<8x64xf32>
    %130 = vector.extract_strided_slice %128 {offsets = [0, 64], sizes = [8, 64], strides = [1, 1]} : vector<8x192xf32> to vector<8x64xf32>
    %131 = vector.extract_strided_slice %128 {offsets = [0, 128], sizes = [8, 64], strides = [1, 1]} : vector<8x192xf32> to vector<8x64xf32>
    %132 = vector.extract_strided_slice %122 {offsets = [0, 192], sizes = [8, 64], strides = [1, 1]} : vector<8x256xf32> to vector<8x64xf32>
    %133 = math.tanh %132 : vector<8x64xf32>
    %134 = arith.mulf %130, %93 : vector<8x64xf32>
    %135 = arith.mulf %129, %133 : vector<8x64xf32>
    %136 = arith.addf %134, %135 : vector<8x64xf32>
    %137 = math.tanh %136 : vector<8x64xf32>
    %138 = arith.mulf %131, %137 : vector<8x64xf32>
    %c3 = arith.constant 3 : index
    %c0_49 = arith.constant 0 : index
    %c0_50 = arith.constant 0 : index
    %139 = vector.load %arg2[%c3, %c0_49, %c0_50] : memref<8x8x8xf32, #tpu.memory_space<vmem>>, vector<1x8x8xf32>
    %140 = vector.shape_cast %139 : vector<1x8x8xf32> to vector<8x8xf32>
    %c0_51 = arith.constant 0 : index
    %c0_52 = arith.constant 0 : index
    %141 = vector.load %arg3[%c0_51, %c0_52] : memref<8x256xf32, #tpu.memory_space<vmem>>, vector<8x256xf32>
    %cst_53 = arith.constant dense<0.000000e+00> : vector<8x256xf32>
    %142 = tpu.matmul %140, %141, %cst_53 {dimension_numbers = #tpu.dot_dimension_numbers<[1], [0], [0], [1], [0, 0, 1, 1], [], []>} : vector<8x8xf32>, vector<8x256xf32>, vector<8x256xf32> -> vector<8x256xf32>
    %c0_54 = arith.constant 0 : index
    %c0_55 = arith.constant 0 : index
    %143 = vector.load %arg4[%c0_54, %c0_55] : memref<128x256xf32, #tpu.memory_space<vmem>>, vector<128x256xf32>
    %cst_56 = arith.constant dense<0.000000e+00> : vector<8x256xf32>
    %144 = tpu.matmul %119, %143, %cst_56 {dimension_numbers = #tpu.dot_dimension_numbers<[1], [0], [0], [1], [0, 0, 1, 1], [], []>} : vector<8x128xf32>, vector<128x256xf32>, vector<8x256xf32> -> vector<8x256xf32>
    %145 = arith.addf %142, %144 : vector<8x256xf32>
    %146 = vector.extract_strided_slice %145 {offsets = [0, 0], sizes = [8, 192], strides = [1, 1]} : vector<8x256xf32> to vector<8x192xf32>
    %147 = arith.negf %146 : vector<8x192xf32>
    %148 = math.exp %147 : vector<8x192xf32>
    %cst_57 = arith.constant 1.000000e+00 : f32
    %149 = vector.broadcast %cst_57 : f32 to vector<8x192xf32>
    %150 = arith.addf %149, %148 : vector<8x192xf32>
    %151 = arith.divf %149, %150 : vector<8x192xf32>
    %152 = vector.extract_strided_slice %151 {offsets = [0, 0], sizes = [8, 64], strides = [1, 1]} : vector<8x192xf32> to vector<8x64xf32>
    %153 = vector.extract_strided_slice %151 {offsets = [0, 64], sizes = [8, 64], strides = [1, 1]} : vector<8x192xf32> to vector<8x64xf32>
    %154 = vector.extract_strided_slice %151 {offsets = [0, 128], sizes = [8, 64], strides = [1, 1]} : vector<8x192xf32> to vector<8x64xf32>
    %155 = vector.extract_strided_slice %145 {offsets = [0, 192], sizes = [8, 64], strides = [1, 1]} : vector<8x256xf32> to vector<8x64xf32>
    %156 = math.tanh %155 : vector<8x64xf32>
    %157 = arith.mulf %153, %116 : vector<8x64xf32>
    %158 = arith.mulf %152, %156 : vector<8x64xf32>
    %159 = arith.addf %157, %158 : vector<8x64xf32>
    %160 = math.tanh %159 : vector<8x64xf32>
    %161 = arith.mulf %154, %160 : vector<8x64xf32>
    %162 = tpu.concatenate %161, %138 in 1 : vector<8x64xf32>, vector<8x64xf32> -> vector<8x128xf32>
    %c0_58 = arith.constant 0 : index
    %c0_59 = arith.constant 0 : index
    %163 = vector.load %arg5[%c0_58, %c0_59] : memref<128x256xf32, #tpu.memory_space<vmem>>, vector<128x256xf32>
    %cst_60 = arith.constant dense<0.000000e+00> : vector<8x256xf32>
    %164 = tpu.matmul %162, %163, %cst_60 {dimension_numbers = #tpu.dot_dimension_numbers<[1], [0], [0], [1], [0, 0, 1, 1], [], []>} : vector<8x128xf32>, vector<128x256xf32>, vector<8x256xf32> -> vector<8x256xf32>
    %165 = arith.addf %164, %5 : vector<8x256xf32>
    %166 = vector.extract_strided_slice %165 {offsets = [0, 0], sizes = [8, 192], strides = [1, 1]} : vector<8x256xf32> to vector<8x192xf32>
    %167 = arith.negf %166 : vector<8x192xf32>
    %168 = math.exp %167 : vector<8x192xf32>
    %cst_61 = arith.constant 1.000000e+00 : f32
    %169 = vector.broadcast %cst_61 : f32 to vector<8x192xf32>
    %170 = arith.addf %169, %168 : vector<8x192xf32>
    %171 = arith.divf %169, %170 : vector<8x192xf32>
    %172 = vector.extract_strided_slice %171 {offsets = [0, 0], sizes = [8, 64], strides = [1, 1]} : vector<8x192xf32> to vector<8x64xf32>
    %173 = vector.extract_strided_slice %171 {offsets = [0, 64], sizes = [8, 64], strides = [1, 1]} : vector<8x192xf32> to vector<8x64xf32>
    %174 = vector.extract_strided_slice %171 {offsets = [0, 128], sizes = [8, 64], strides = [1, 1]} : vector<8x192xf32> to vector<8x64xf32>
    %175 = vector.extract_strided_slice %165 {offsets = [0, 192], sizes = [8, 64], strides = [1, 1]} : vector<8x256xf32> to vector<8x64xf32>
    %176 = math.tanh %175 : vector<8x64xf32>
    %177 = arith.mulf %173, %136 : vector<8x64xf32>
    %178 = arith.mulf %172, %176 : vector<8x64xf32>
    %179 = arith.addf %177, %178 : vector<8x64xf32>
    %180 = math.tanh %179 : vector<8x64xf32>
    %181 = arith.mulf %174, %180 : vector<8x64xf32>
    %c4 = arith.constant 4 : index
    %c0_62 = arith.constant 0 : index
    %c0_63 = arith.constant 0 : index
    %182 = vector.load %arg2[%c4, %c0_62, %c0_63] : memref<8x8x8xf32, #tpu.memory_space<vmem>>, vector<1x8x8xf32>
    %183 = vector.shape_cast %182 : vector<1x8x8xf32> to vector<8x8xf32>
    %c0_64 = arith.constant 0 : index
    %c0_65 = arith.constant 0 : index
    %184 = vector.load %arg3[%c0_64, %c0_65] : memref<8x256xf32, #tpu.memory_space<vmem>>, vector<8x256xf32>
    %cst_66 = arith.constant dense<0.000000e+00> : vector<8x256xf32>
    %185 = tpu.matmul %183, %184, %cst_66 {dimension_numbers = #tpu.dot_dimension_numbers<[1], [0], [0], [1], [0, 0, 1, 1], [], []>} : vector<8x8xf32>, vector<8x256xf32>, vector<8x256xf32> -> vector<8x256xf32>
    %c0_67 = arith.constant 0 : index
    %c0_68 = arith.constant 0 : index
    %186 = vector.load %arg4[%c0_67, %c0_68] : memref<128x256xf32, #tpu.memory_space<vmem>>, vector<128x256xf32>
    %cst_69 = arith.constant dense<0.000000e+00> : vector<8x256xf32>
    %187 = tpu.matmul %162, %186, %cst_69 {dimension_numbers = #tpu.dot_dimension_numbers<[1], [0], [0], [1], [0, 0, 1, 1], [], []>} : vector<8x128xf32>, vector<128x256xf32>, vector<8x256xf32> -> vector<8x256xf32>
    %188 = arith.addf %185, %187 : vector<8x256xf32>
    %189 = vector.extract_strided_slice %188 {offsets = [0, 0], sizes = [8, 192], strides = [1, 1]} : vector<8x256xf32> to vector<8x192xf32>
    %190 = arith.negf %189 : vector<8x192xf32>
    %191 = math.exp %190 : vector<8x192xf32>
    %cst_70 = arith.constant 1.000000e+00 : f32
    %192 = vector.broadcast %cst_70 : f32 to vector<8x192xf32>
    %193 = arith.addf %192, %191 : vector<8x192xf32>
    %194 = arith.divf %192, %193 : vector<8x192xf32>
    %195 = vector.extract_strided_slice %194 {offsets = [0, 0], sizes = [8, 64], strides = [1, 1]} : vector<8x192xf32> to vector<8x64xf32>
    %196 = vector.extract_strided_slice %194 {offsets = [0, 64], sizes = [8, 64], strides = [1, 1]} : vector<8x192xf32> to vector<8x64xf32>
    %197 = vector.extract_strided_slice %194 {offsets = [0, 128], sizes = [8, 64], strides = [1, 1]} : vector<8x192xf32> to vector<8x64xf32>
    %198 = vector.extract_strided_slice %188 {offsets = [0, 192], sizes = [8, 64], strides = [1, 1]} : vector<8x256xf32> to vector<8x64xf32>
    %199 = math.tanh %198 : vector<8x64xf32>
    %200 = arith.mulf %196, %159 : vector<8x64xf32>
    %201 = arith.mulf %195, %199 : vector<8x64xf32>
    %202 = arith.addf %200, %201 : vector<8x64xf32>
    %203 = math.tanh %202 : vector<8x64xf32>
    %204 = arith.mulf %197, %203 : vector<8x64xf32>
    %205 = tpu.concatenate %204, %181 in 1 : vector<8x64xf32>, vector<8x64xf32> -> vector<8x128xf32>
    %c0_71 = arith.constant 0 : index
    %c0_72 = arith.constant 0 : index
    %206 = vector.load %arg5[%c0_71, %c0_72] : memref<128x256xf32, #tpu.memory_space<vmem>>, vector<128x256xf32>
    %cst_73 = arith.constant dense<0.000000e+00> : vector<8x256xf32>
    %207 = tpu.matmul %205, %206, %cst_73 {dimension_numbers = #tpu.dot_dimension_numbers<[1], [0], [0], [1], [0, 0, 1, 1], [], []>} : vector<8x128xf32>, vector<128x256xf32>, vector<8x256xf32> -> vector<8x256xf32>
    %208 = arith.addf %207, %5 : vector<8x256xf32>
    %209 = vector.extract_strided_slice %208 {offsets = [0, 0], sizes = [8, 192], strides = [1, 1]} : vector<8x256xf32> to vector<8x192xf32>
    %210 = arith.negf %209 : vector<8x192xf32>
    %211 = math.exp %210 : vector<8x192xf32>
    %cst_74 = arith.constant 1.000000e+00 : f32
    %212 = vector.broadcast %cst_74 : f32 to vector<8x192xf32>
    %213 = arith.addf %212, %211 : vector<8x192xf32>
    %214 = arith.divf %212, %213 : vector<8x192xf32>
    %215 = vector.extract_strided_slice %214 {offsets = [0, 0], sizes = [8, 64], strides = [1, 1]} : vector<8x192xf32> to vector<8x64xf32>
    %216 = vector.extract_strided_slice %214 {offsets = [0, 64], sizes = [8, 64], strides = [1, 1]} : vector<8x192xf32> to vector<8x64xf32>
    %217 = vector.extract_strided_slice %214 {offsets = [0, 128], sizes = [8, 64], strides = [1, 1]} : vector<8x192xf32> to vector<8x64xf32>
    %218 = vector.extract_strided_slice %208 {offsets = [0, 192], sizes = [8, 64], strides = [1, 1]} : vector<8x256xf32> to vector<8x64xf32>
    %219 = math.tanh %218 : vector<8x64xf32>
    %220 = arith.mulf %216, %179 : vector<8x64xf32>
    %221 = arith.mulf %215, %219 : vector<8x64xf32>
    %222 = arith.addf %220, %221 : vector<8x64xf32>
    %223 = math.tanh %222 : vector<8x64xf32>
    %224 = arith.mulf %217, %223 : vector<8x64xf32>
    %c5 = arith.constant 5 : index
    %c0_75 = arith.constant 0 : index
    %c0_76 = arith.constant 0 : index
    %225 = vector.load %arg2[%c5, %c0_75, %c0_76] : memref<8x8x8xf32, #tpu.memory_space<vmem>>, vector<1x8x8xf32>
    %226 = vector.shape_cast %225 : vector<1x8x8xf32> to vector<8x8xf32>
    %c0_77 = arith.constant 0 : index
    %c0_78 = arith.constant 0 : index
    %227 = vector.load %arg3[%c0_77, %c0_78] : memref<8x256xf32, #tpu.memory_space<vmem>>, vector<8x256xf32>
    %cst_79 = arith.constant dense<0.000000e+00> : vector<8x256xf32>
    %228 = tpu.matmul %226, %227, %cst_79 {dimension_numbers = #tpu.dot_dimension_numbers<[1], [0], [0], [1], [0, 0, 1, 1], [], []>} : vector<8x8xf32>, vector<8x256xf32>, vector<8x256xf32> -> vector<8x256xf32>
    %c0_80 = arith.constant 0 : index
    %c0_81 = arith.constant 0 : index
    %229 = vector.load %arg4[%c0_80, %c0_81] : memref<128x256xf32, #tpu.memory_space<vmem>>, vector<128x256xf32>
    %cst_82 = arith.constant dense<0.000000e+00> : vector<8x256xf32>
    %230 = tpu.matmul %205, %229, %cst_82 {dimension_numbers = #tpu.dot_dimension_numbers<[1], [0], [0], [1], [0, 0, 1, 1], [], []>} : vector<8x128xf32>, vector<128x256xf32>, vector<8x256xf32> -> vector<8x256xf32>
    %231 = arith.addf %228, %230 : vector<8x256xf32>
    %232 = vector.extract_strided_slice %231 {offsets = [0, 0], sizes = [8, 192], strides = [1, 1]} : vector<8x256xf32> to vector<8x192xf32>
    %233 = arith.negf %232 : vector<8x192xf32>
    %234 = math.exp %233 : vector<8x192xf32>
    %cst_83 = arith.constant 1.000000e+00 : f32
    %235 = vector.broadcast %cst_83 : f32 to vector<8x192xf32>
    %236 = arith.addf %235, %234 : vector<8x192xf32>
    %237 = arith.divf %235, %236 : vector<8x192xf32>
    %238 = vector.extract_strided_slice %237 {offsets = [0, 0], sizes = [8, 64], strides = [1, 1]} : vector<8x192xf32> to vector<8x64xf32>
    %239 = vector.extract_strided_slice %237 {offsets = [0, 64], sizes = [8, 64], strides = [1, 1]} : vector<8x192xf32> to vector<8x64xf32>
    %240 = vector.extract_strided_slice %237 {offsets = [0, 128], sizes = [8, 64], strides = [1, 1]} : vector<8x192xf32> to vector<8x64xf32>
    %241 = vector.extract_strided_slice %231 {offsets = [0, 192], sizes = [8, 64], strides = [1, 1]} : vector<8x256xf32> to vector<8x64xf32>
    %242 = math.tanh %241 : vector<8x64xf32>
    %243 = arith.mulf %239, %202 : vector<8x64xf32>
    %244 = arith.mulf %238, %242 : vector<8x64xf32>
    %245 = arith.addf %243, %244 : vector<8x64xf32>
    %246 = math.tanh %245 : vector<8x64xf32>
    %247 = arith.mulf %240, %246 : vector<8x64xf32>
    %248 = tpu.concatenate %247, %224 in 1 : vector<8x64xf32>, vector<8x64xf32> -> vector<8x128xf32>
    %c0_84 = arith.constant 0 : index
    %c0_85 = arith.constant 0 : index
    %249 = vector.load %arg5[%c0_84, %c0_85] : memref<128x256xf32, #tpu.memory_space<vmem>>, vector<128x256xf32>
    %cst_86 = arith.constant dense<0.000000e+00> : vector<8x256xf32>
    %250 = tpu.matmul %248, %249, %cst_86 {dimension_numbers = #tpu.dot_dimension_numbers<[1], [0], [0], [1], [0, 0, 1, 1], [], []>} : vector<8x128xf32>, vector<128x256xf32>, vector<8x256xf32> -> vector<8x256xf32>
    %251 = arith.addf %250, %5 : vector<8x256xf32>
    %252 = vector.extract_strided_slice %251 {offsets = [0, 0], sizes = [8, 192], strides = [1, 1]} : vector<8x256xf32> to vector<8x192xf32>
    %253 = arith.negf %252 : vector<8x192xf32>
    %254 = math.exp %253 : vector<8x192xf32>
    %cst_87 = arith.constant 1.000000e+00 : f32
    %255 = vector.broadcast %cst_87 : f32 to vector<8x192xf32>
    %256 = arith.addf %255, %254 : vector<8x192xf32>
    %257 = arith.divf %255, %256 : vector<8x192xf32>
    %258 = vector.extract_strided_slice %257 {offsets = [0, 0], sizes = [8, 64], strides = [1, 1]} : vector<8x192xf32> to vector<8x64xf32>
    %259 = vector.extract_strided_slice %257 {offsets = [0, 64], sizes = [8, 64], strides = [1, 1]} : vector<8x192xf32> to vector<8x64xf32>
    %260 = vector.extract_strided_slice %257 {offsets = [0, 128], sizes = [8, 64], strides = [1, 1]} : vector<8x192xf32> to vector<8x64xf32>
    %261 = vector.extract_strided_slice %251 {offsets = [0, 192], sizes = [8, 64], strides = [1, 1]} : vector<8x256xf32> to vector<8x64xf32>
    %262 = math.tanh %261 : vector<8x64xf32>
    %263 = arith.mulf %259, %222 : vector<8x64xf32>
    %264 = arith.mulf %258, %262 : vector<8x64xf32>
    %265 = arith.addf %263, %264 : vector<8x64xf32>
    %266 = math.tanh %265 : vector<8x64xf32>
    %267 = arith.mulf %260, %266 : vector<8x64xf32>
    %c6 = arith.constant 6 : index
    %c0_88 = arith.constant 0 : index
    %c0_89 = arith.constant 0 : index
    %268 = vector.load %arg2[%c6, %c0_88, %c0_89] : memref<8x8x8xf32, #tpu.memory_space<vmem>>, vector<1x8x8xf32>
    %269 = vector.shape_cast %268 : vector<1x8x8xf32> to vector<8x8xf32>
    %c0_90 = arith.constant 0 : index
    %c0_91 = arith.constant 0 : index
    %270 = vector.load %arg3[%c0_90, %c0_91] : memref<8x256xf32, #tpu.memory_space<vmem>>, vector<8x256xf32>
    %cst_92 = arith.constant dense<0.000000e+00> : vector<8x256xf32>
    %271 = tpu.matmul %269, %270, %cst_92 {dimension_numbers = #tpu.dot_dimension_numbers<[1], [0], [0], [1], [0, 0, 1, 1], [], []>} : vector<8x8xf32>, vector<8x256xf32>, vector<8x256xf32> -> vector<8x256xf32>
    %c0_93 = arith.constant 0 : index
    %c0_94 = arith.constant 0 : index
    %272 = vector.load %arg4[%c0_93, %c0_94] : memref<128x256xf32, #tpu.memory_space<vmem>>, vector<128x256xf32>
    %cst_95 = arith.constant dense<0.000000e+00> : vector<8x256xf32>
    %273 = tpu.matmul %248, %272, %cst_95 {dimension_numbers = #tpu.dot_dimension_numbers<[1], [0], [0], [1], [0, 0, 1, 1], [], []>} : vector<8x128xf32>, vector<128x256xf32>, vector<8x256xf32> -> vector<8x256xf32>
    %274 = arith.addf %271, %273 : vector<8x256xf32>
    %275 = vector.extract_strided_slice %274 {offsets = [0, 0], sizes = [8, 192], strides = [1, 1]} : vector<8x256xf32> to vector<8x192xf32>
    %276 = arith.negf %275 : vector<8x192xf32>
    %277 = math.exp %276 : vector<8x192xf32>
    %cst_96 = arith.constant 1.000000e+00 : f32
    %278 = vector.broadcast %cst_96 : f32 to vector<8x192xf32>
    %279 = arith.addf %278, %277 : vector<8x192xf32>
    %280 = arith.divf %278, %279 : vector<8x192xf32>
    %281 = vector.extract_strided_slice %280 {offsets = [0, 0], sizes = [8, 64], strides = [1, 1]} : vector<8x192xf32> to vector<8x64xf32>
    %282 = vector.extract_strided_slice %280 {offsets = [0, 64], sizes = [8, 64], strides = [1, 1]} : vector<8x192xf32> to vector<8x64xf32>
    %283 = vector.extract_strided_slice %280 {offsets = [0, 128], sizes = [8, 64], strides = [1, 1]} : vector<8x192xf32> to vector<8x64xf32>
    %284 = vector.extract_strided_slice %274 {offsets = [0, 192], sizes = [8, 64], strides = [1, 1]} : vector<8x256xf32> to vector<8x64xf32>
    %285 = math.tanh %284 : vector<8x64xf32>
    %286 = arith.mulf %282, %245 : vector<8x64xf32>
    %287 = arith.mulf %281, %285 : vector<8x64xf32>
    %288 = arith.addf %286, %287 : vector<8x64xf32>
    %289 = math.tanh %288 : vector<8x64xf32>
    %290 = arith.mulf %283, %289 : vector<8x64xf32>
    %291 = tpu.concatenate %290, %267 in 1 : vector<8x64xf32>, vector<8x64xf32> -> vector<8x128xf32>
    %c0_97 = arith.constant 0 : index
    %c0_98 = arith.constant 0 : index
    %292 = vector.load %arg5[%c0_97, %c0_98] : memref<128x256xf32, #tpu.memory_space<vmem>>, vector<128x256xf32>
    %cst_99 = arith.constant dense<0.000000e+00> : vector<8x256xf32>
    %293 = tpu.matmul %291, %292, %cst_99 {dimension_numbers = #tpu.dot_dimension_numbers<[1], [0], [0], [1], [0, 0, 1, 1], [], []>} : vector<8x128xf32>, vector<128x256xf32>, vector<8x256xf32> -> vector<8x256xf32>
    %294 = arith.addf %293, %5 : vector<8x256xf32>
    %295 = vector.extract_strided_slice %294 {offsets = [0, 0], sizes = [8, 192], strides = [1, 1]} : vector<8x256xf32> to vector<8x192xf32>
    %296 = arith.negf %295 : vector<8x192xf32>
    %297 = math.exp %296 : vector<8x192xf32>
    %cst_100 = arith.constant 1.000000e+00 : f32
    %298 = vector.broadcast %cst_100 : f32 to vector<8x192xf32>
    %299 = arith.addf %298, %297 : vector<8x192xf32>
    %300 = arith.divf %298, %299 : vector<8x192xf32>
    %301 = vector.extract_strided_slice %300 {offsets = [0, 0], sizes = [8, 64], strides = [1, 1]} : vector<8x192xf32> to vector<8x64xf32>
    %302 = vector.extract_strided_slice %300 {offsets = [0, 64], sizes = [8, 64], strides = [1, 1]} : vector<8x192xf32> to vector<8x64xf32>
    %303 = vector.extract_strided_slice %300 {offsets = [0, 128], sizes = [8, 64], strides = [1, 1]} : vector<8x192xf32> to vector<8x64xf32>
    %304 = vector.extract_strided_slice %294 {offsets = [0, 192], sizes = [8, 64], strides = [1, 1]} : vector<8x256xf32> to vector<8x64xf32>
    %305 = math.tanh %304 : vector<8x64xf32>
    %306 = arith.mulf %302, %265 : vector<8x64xf32>
    %307 = arith.mulf %301, %305 : vector<8x64xf32>
    %308 = arith.addf %306, %307 : vector<8x64xf32>
    %309 = math.tanh %308 : vector<8x64xf32>
    %310 = arith.mulf %303, %309 : vector<8x64xf32>
    %c7 = arith.constant 7 : index
    %c0_101 = arith.constant 0 : index
    %c0_102 = arith.constant 0 : index
    %311 = vector.load %arg2[%c7, %c0_101, %c0_102] : memref<8x8x8xf32, #tpu.memory_space<vmem>>, vector<1x8x8xf32>
    %312 = vector.shape_cast %311 : vector<1x8x8xf32> to vector<8x8xf32>
    %c0_103 = arith.constant 0 : index
    %c0_104 = arith.constant 0 : index
    %313 = vector.load %arg3[%c0_103, %c0_104] : memref<8x256xf32, #tpu.memory_space<vmem>>, vector<8x256xf32>
    %cst_105 = arith.constant dense<0.000000e+00> : vector<8x256xf32>
    %314 = tpu.matmul %312, %313, %cst_105 {dimension_numbers = #tpu.dot_dimension_numbers<[1], [0], [0], [1], [0, 0, 1, 1], [], []>} : vector<8x8xf32>, vector<8x256xf32>, vector<8x256xf32> -> vector<8x256xf32>
    %c0_106 = arith.constant 0 : index
    %c0_107 = arith.constant 0 : index
    %315 = vector.load %arg4[%c0_106, %c0_107] : memref<128x256xf32, #tpu.memory_space<vmem>>, vector<128x256xf32>
    %cst_108 = arith.constant dense<0.000000e+00> : vector<8x256xf32>
    %316 = tpu.matmul %291, %315, %cst_108 {dimension_numbers = #tpu.dot_dimension_numbers<[1], [0], [0], [1], [0, 0, 1, 1], [], []>} : vector<8x128xf32>, vector<128x256xf32>, vector<8x256xf32> -> vector<8x256xf32>
    %317 = arith.addf %314, %316 : vector<8x256xf32>
    %318 = vector.extract_strided_slice %317 {offsets = [0, 0], sizes = [8, 192], strides = [1, 1]} : vector<8x256xf32> to vector<8x192xf32>
    %319 = arith.negf %318 : vector<8x192xf32>
    %320 = math.exp %319 : vector<8x192xf32>
    %cst_109 = arith.constant 1.000000e+00 : f32
    %321 = vector.broadcast %cst_109 : f32 to vector<8x192xf32>
    %322 = arith.addf %321, %320 : vector<8x192xf32>
    %323 = arith.divf %321, %322 : vector<8x192xf32>
    %324 = vector.extract_strided_slice %323 {offsets = [0, 0], sizes = [8, 64], strides = [1, 1]} : vector<8x192xf32> to vector<8x64xf32>
    %325 = vector.extract_strided_slice %323 {offsets = [0, 64], sizes = [8, 64], strides = [1, 1]} : vector<8x192xf32> to vector<8x64xf32>
    %326 = vector.extract_strided_slice %323 {offsets = [0, 128], sizes = [8, 64], strides = [1, 1]} : vector<8x192xf32> to vector<8x64xf32>
    %327 = vector.extract_strided_slice %317 {offsets = [0, 192], sizes = [8, 64], strides = [1, 1]} : vector<8x256xf32> to vector<8x64xf32>
    %328 = math.tanh %327 : vector<8x64xf32>
    %329 = arith.mulf %325, %288 : vector<8x64xf32>
    %330 = arith.mulf %324, %328 : vector<8x64xf32>
    %331 = arith.addf %329, %330 : vector<8x64xf32>
    %332 = math.tanh %331 : vector<8x64xf32>
    %333 = arith.mulf %326, %332 : vector<8x64xf32>
    %334 = tpu.concatenate %333, %310 in 1 : vector<8x64xf32>, vector<8x64xf32> -> vector<8x128xf32>
    %c0_110 = arith.constant 0 : index
    %c0_111 = arith.constant 0 : index
    %335 = vector.load %arg5[%c0_110, %c0_111] : memref<128x256xf32, #tpu.memory_space<vmem>>, vector<128x256xf32>
    %cst_112 = arith.constant dense<0.000000e+00> : vector<8x256xf32>
    %336 = tpu.matmul %334, %335, %cst_112 {dimension_numbers = #tpu.dot_dimension_numbers<[1], [0], [0], [1], [0, 0, 1, 1], [], []>} : vector<8x128xf32>, vector<128x256xf32>, vector<8x256xf32> -> vector<8x256xf32>
    %337 = arith.addf %336, %5 : vector<8x256xf32>
    %338 = vector.extract_strided_slice %337 {offsets = [0, 0], sizes = [8, 192], strides = [1, 1]} : vector<8x256xf32> to vector<8x192xf32>
    %339 = arith.negf %338 : vector<8x192xf32>
    %340 = math.exp %339 : vector<8x192xf32>
    %cst_113 = arith.constant 1.000000e+00 : f32
    %341 = vector.broadcast %cst_113 : f32 to vector<8x192xf32>
    %342 = arith.addf %341, %340 : vector<8x192xf32>
    %343 = arith.divf %341, %342 : vector<8x192xf32>
    %344 = vector.extract_strided_slice %343 {offsets = [0, 0], sizes = [8, 64], strides = [1, 1]} : vector<8x192xf32> to vector<8x64xf32>
    %345 = vector.extract_strided_slice %343 {offsets = [0, 64], sizes = [8, 64], strides = [1, 1]} : vector<8x192xf32> to vector<8x64xf32>
    %346 = vector.extract_strided_slice %343 {offsets = [0, 128], sizes = [8, 64], strides = [1, 1]} : vector<8x192xf32> to vector<8x64xf32>
    %347 = vector.extract_strided_slice %337 {offsets = [0, 192], sizes = [8, 64], strides = [1, 1]} : vector<8x256xf32> to vector<8x64xf32>
    %348 = math.tanh %347 : vector<8x64xf32>
    %349 = arith.mulf %345, %308 : vector<8x64xf32>
    %350 = arith.mulf %344, %348 : vector<8x64xf32>
    %351 = arith.addf %349, %350 : vector<8x64xf32>
    %352 = math.tanh %351 : vector<8x64xf32>
    %353 = arith.mulf %346, %352 : vector<8x64xf32>
    %c0_114 = arith.constant 0 : index
    %c0_115 = arith.constant 0 : index
    %354 = vector.load %arg14[%c0_114, %c0_115] : memref<8x128xf32, #tpu.memory_space<vmem>>, vector<8x128xf32>
    tpu.vector_store %arg14[%c0_114, %c0_115], %334 {strides = array<i32>} : memref<8x128xf32, #tpu.memory_space<vmem>>, vector<8x128xf32>,
    %c0_116 = arith.constant 0 : index
    %c0_117 = arith.constant 0 : index
    %355 = vector.load %arg15[%c0_116, %c0_117] : memref<8x64xf32, #tpu.memory_space<vmem>>, vector<8x64xf32>
    tpu.vector_store %arg15[%c0_116, %c0_117], %353 {strides = array<i32>} : memref<8x64xf32, #tpu.memory_space<vmem>>, vector<8x64xf32>,
    %c0_118 = arith.constant 0 : index
    %c0_119 = arith.constant 0 : index
    %356 = vector.load %arg16[%c0_118, %c0_119] : memref<8x64xf32, #tpu.memory_space<vmem>>, vector<8x64xf32>
    tpu.vector_store %arg16[%c0_118, %c0_119], %331 {strides = array<i32>} : memref<8x64xf32, #tpu.memory_space<vmem>>, vector<8x64xf32>,
    %c0_120 = arith.constant 0 : index
    %c0_121 = arith.constant 0 : index
    %357 = vector.load %arg17[%c0_120, %c0_121] : memref<8x64xf32, #tpu.memory_space<vmem>>, vector<8x64xf32>
    tpu.vector_store %arg17[%c0_120, %c0_121], %351 {strides = array<i32>} : memref<8x64xf32, #tpu.memory_space<vmem>>, vector<8x64xf32>,
    %c0_i32_122 = arith.constant 0 : i32
    %358 = arith.cmpi eq, %arg1, %c0_i32_122 : i32
    %359 = arith.extui %358 : i1 to i32
    %c0_i32_123 = arith.constant 0 : i32
    %360 = arith.cmpi ne, %359, %c0_i32_123 : i32
    scf.if %360 {
      %c0_124 = arith.constant 0 : index
      %c0_125 = arith.constant 0 : index
      %361 = vector.load %arg15[%c0_124, %c0_125] : memref<8x64xf32, #tpu.memory_space<vmem>>, vector<8x64xf32>
      %c0_126 = arith.constant 0 : index
      %c0_127 = arith.constant 0 : index
      %362 = vector.load %arg7[%c0_126, %c0_127] : memref<64x32xf32, #tpu.memory_space<vmem>>, vector<64x32xf32>
      %cst_128 = arith.constant dense<0.000000e+00> : vector<8x32xf32>
      %363 = tpu.matmul %361, %362, %cst_128 {dimension_numbers = #tpu.dot_dimension_numbers<[1], [0], [0], [1], [0, 0, 1, 1], [], []>} : vector<8x64xf32>, vector<64x32xf32>, vector<8x32xf32> -> vector<8x32xf32>
      %c0_129 = arith.constant 0 : index
      %c0_130 = arith.constant 0 : index
      %364 = vector.load %arg8[%c0_129, %c0_130] : memref<1x32xf32, #tpu.memory_space<vmem>>, vector<1x32xf32>
      %365 = vector.broadcast %364 : vector<1x32xf32> to vector<8x32xf32>
      %366 = arith.addf %363, %365 : vector<8x32xf32>
      %cst_131 = arith.constant 0.000000e+00 : f32
      %367 = vector.broadcast %cst_131 : f32 to vector<8x32xf32>
      %368 = arith.maximumf %366, %367 : vector<8x32xf32>
      %c0_132 = arith.constant 0 : index
      %c0_133 = arith.constant 0 : index
      %369 = vector.load %arg9[%c0_132, %c0_133] : memref<32x16xf32, #tpu.memory_space<vmem>>, vector<32x16xf32>
      %cst_134 = arith.constant dense<0.000000e+00> : vector<8x16xf32>
      %370 = tpu.matmul %368, %369, %cst_134 {dimension_numbers = #tpu.dot_dimension_numbers<[1], [0], [0], [1], [0, 0, 1, 1], [], []>} : vector<8x32xf32>, vector<32x16xf32>, vector<8x16xf32> -> vector<8x16xf32>
      %c0_135 = arith.constant 0 : index
      %c0_136 = arith.constant 0 : index
      %371 = vector.load %arg10[%c0_135, %c0_136] : memref<1x16xf32, #tpu.memory_space<vmem>>, vector<1x16xf32>
      %372 = vector.broadcast %371 : vector<1x16xf32> to vector<8x16xf32>
      %373 = arith.addf %370, %372 : vector<8x16xf32>
      %cst_137 = arith.constant 0.000000e+00 : f32
      %374 = vector.broadcast %cst_137 : f32 to vector<8x16xf32>
      %375 = arith.maximumf %373, %374 : vector<8x16xf32>
      %c0_138 = arith.constant 0 : index
      %c0_139 = arith.constant 0 : index
      %376 = vector.load %arg11[%c0_138, %c0_139] : memref<16x1xf32, #tpu.memory_space<vmem>>, vector<16x1xf32>
      %cst_140 = arith.constant dense<0.000000e+00> : vector<8x1xf32>
      %377 = tpu.matmul %375, %376, %cst_140 {dimension_numbers = #tpu.dot_dimension_numbers<[1], [0], [0], [1], [0, 0, 1, 1], [], []>} : vector<8x16xf32>, vector<16x1xf32>, vector<8x1xf32> -> vector<8x1xf32>
      %c0_141 = arith.constant 0 : index
      %c0_142 = arith.constant 0 : index
      %378 = vector.load %arg12[%c0_141, %c0_142] : memref<1x1xf32, #tpu.memory_space<vmem>>, vector<1x1xf32>
      %379 = vector.broadcast %378 : vector<1x1xf32> to vector<8x1xf32>
      %380 = arith.addf %377, %379 : vector<8x1xf32>
      %c0_143 = arith.constant 0 : index
      %c0_144 = arith.constant 0 : index
      %381 = vector.load %arg13[%c0_143, %c0_144] : memref<8x1xf32, #tpu.memory_space<vmem>>, vector<8x1xf32>
      tpu.vector_store %arg13[%c0_143, %c0_144], %380 {strides = array<i32>} : memref<8x1xf32, #tpu.memory_space<vmem>>, vector<8x1xf32>,
    } else {
    }
    return
  }
  func.func @transform_0(%arg0: i32, %arg1: i32) -> (i32, i32, i32) {
    %c0_i32 = arith.constant 0 : i32
    %c0_i32_0 = arith.constant 0 : i32
    return %arg1, %arg0, %c0_i32 : i32, i32, i32
  }
  func.func @transform_1(%arg0: i32, %arg1: i32) -> (i32, i32) {
    %c0_i32 = arith.constant 0 : i32
    %c0_i32_0 = arith.constant 0 : i32
    %c0_i32_1 = arith.constant 0 : i32
    return %c0_i32, %c0_i32_0 : i32, i32
  }
  func.func @transform_2(%arg0: i32, %arg1: i32) -> (i32, i32) {
    %c0_i32 = arith.constant 0 : i32
    %c0_i32_0 = arith.constant 0 : i32
    %c0_i32_1 = arith.constant 0 : i32
    return %c0_i32, %c0_i32_0 : i32, i32
  }
  func.func @transform_3(%arg0: i32, %arg1: i32) -> (i32, i32) {
    %c0_i32 = arith.constant 0 : i32
    %c0_i32_0 = arith.constant 0 : i32
    %c0_i32_1 = arith.constant 0 : i32
    return %c0_i32, %c0_i32_0 : i32, i32
  }
  func.func @transform_4(%arg0: i32, %arg1: i32) -> (i32, i32) {
    %c0_i32 = arith.constant 0 : i32
    %c0_i32_0 = arith.constant 0 : i32
    %c0_i32_1 = arith.constant 0 : i32
    return %c0_i32, %c0_i32_0 : i32, i32
  }
  func.func @transform_5(%arg0: i32, %arg1: i32) -> (i32, i32) {
    %c0_i32 = arith.constant 0 : i32
    %c0_i32_0 = arith.constant 0 : i32
    %c0_i32_1 = arith.constant 0 : i32
    return %c0_i32, %c0_i32_0 : i32, i32
  }
  func.func @transform_6(%arg0: i32, %arg1: i32) -> (i32, i32) {
    %c0_i32 = arith.constant 0 : i32
    %c0_i32_0 = arith.constant 0 : i32
    %c0_i32_1 = arith.constant 0 : i32
    return %c0_i32, %c0_i32_0 : i32, i32
  }
  func.func @transform_7(%arg0: i32, %arg1: i32) -> (i32, i32) {
    %c0_i32 = arith.constant 0 : i32
    %c0_i32_0 = arith.constant 0 : i32
    %c0_i32_1 = arith.constant 0 : i32
    return %c0_i32, %c0_i32_0 : i32, i32
  }
  func.func @transform_8(%arg0: i32, %arg1: i32) -> (i32, i32) {
    %c0_i32 = arith.constant 0 : i32
    %c0_i32_0 = arith.constant 0 : i32
    %c0_i32_1 = arith.constant 0 : i32
    return %c0_i32, %c0_i32_0 : i32, i32
  }
  func.func @transform_9(%arg0: i32, %arg1: i32) -> (i32, i32) {
    %c0_i32 = arith.constant 0 : i32
    %c0_i32_0 = arith.constant 0 : i32
    %c0_i32_1 = arith.constant 0 : i32
    return %c0_i32, %c0_i32_0 : i32, i32
  }
  func.func @transform_10(%arg0: i32, %arg1: i32) -> (i32, i32) {
    %c0_i32 = arith.constant 0 : i32
    %c0_i32_0 = arith.constant 0 : i32
    %c0_i32_1 = arith.constant 0 : i32
    return %c0_i32, %c0_i32_0 : i32, i32
  }
  func.func @transform_11(%arg0: i32, %arg1: i32) -> (i32, i32) {
    %c0_i32 = arith.constant 0 : i32
    %c0_i32_0 = arith.constant 0 : i32
    return %arg0, %c0_i32 : i32, i32
  }
}

</mosaic_0001>

<bundles_post_ra>
// kernel: discriminator_forward.1
= control target key start
LH: loop header
LB: loop body
LE: loop exit
PB: predicated region body
PF: predicated region fallthrough
CT: control target
= control target key end

     0   :  { %v3538_v3 = vmov 0.0   ;;  %vm171_vm0 = vcmask 64512   ;;  %vm45_vm1 = vcmask 523264   ;;  %vm3541_vm2 = vmmov 0   ;;  %s4428_s2 = inlined_call_operand.vmem [shape: f32[128,256], index: 2, kind: input, shape index: {}]   ;;  %s4429_s1 = inlined_call_operand.vmem [shape: f32[8,256], index: 1, kind: input, shape index: {}]   ;;  %s4430_s0 = inlined_call_operand.vmem [shape: f32[8,8,8], index: 0, kind: input, shape index: {}]   ;;  %s4431_s3 = inlined_call_operand.vmem [shape: f32[128,256], index: 3, kind: input, shape index: {}]   ;;  %s4432_s4 = inlined_call_operand.vmem [shape: f32[1,256], index: 4, kind: input, shape index: {}]   ;;  %s4433_s5 = inlined_call_operand.vmem [shape: f32[64,32], index: 5, kind: input, shape index: {}]   ;;  %s4434_s7 = inlined_call_operand.vmem [shape: f32[32,16], index: 7, kind: input, shape index: {}]   ;;  %s4435_s6 = inlined_call_operand.vmem [shape: f32[1,32], index: 6, kind: input, shape index: {}]   ;;  %s4436_s9 = inlined_call_operand.vmem [shape: f32[16,1], index: 9, kind: input, shape index: {}]   ;;  %s4437_s10 = inlined_call_operand.<no memory space> [shape: f32[1,1], index: 10, kind: input, shape index: {}]   ;;  %s4438_s8 = inlined_call_operand.vmem [shape: f32[1,16], index: 8, kind: input, shape index: {}]   ;;  %s4439_s11 = inlined_call_operand.vmem [shape: f32[8,1], index: 11, kind: output, shape index: {}]  }
   0x1   :  { %v69_v0 = vld [vmem:[%s4428_s2 + $0x8] sm:$0xff]  ;;  %v71_v1 = vld [vmem:[%s4428_s2 + $0x18] sm:$0xff]  ;;  %v68_v2 = vld [vmem:[%s4428_s2] sm:$0xff]  ;;  %239 = vmatprep.mubr.f32.mxu1 %v3538_v3  ;;  %164 = vmatprep.mubr.f32.mxu0 %v3538_v3  ;;  %47 = vst.msk [vmem:[#allocation4] sm:$0xff] %vm45_vm1, %v3538_v3  ;;  %vm2520_vm3 = vcmask 261120   ;;  %vm2604_vm4 = vcmask 130048  }
   0x2   :  { %v3613_v4 = vpack.c.bf16 %v71_v1, %v69_v0  ;;  %v70_v5 = vld [vmem:[%s4428_s2 + $0x10] sm:$0xff]  ;;  %v73_v6 = vld [vmem:[%s4428_s2 + $0x28] sm:$0xff]  ;;  %v75_v7 = vld [vmem:[%s4428_s2 + $0x38] sm:$0xff]  ;;  %46 = vst.msk [vmem:[#allocation3] sm:$0xff] %vm45_vm1, %v3538_v3  ;;  %vm2678_vm5 = vcmask 7168  }
   0x3   :  { %v3624_v8 = vpack.c.bf16 %v70_v5, %v68_v2  ;;  %v3626_v9 = vpack.c.bf16 %v75_v7, %v73_v6  ;;  %v72_v10 = vld [vmem:[%s4428_s2 + $0x20] sm:$0xff]  ;;  %v74_v11 = vld [vmem:[%s4428_s2 + $0x30] sm:$0xff]  ;;  %v77_v12 = vld [vmem:[%s4428_s2 + $0x48] sm:$0xff]  ;;  %48 = vst.msk [vmem:[#allocation5] sm:$0xff] %vm45_vm1, %v3538_v3 }
   0x4   :  { %2792 = vmatprep.subr.bf16.mxu0 %v3613_v4  ;;  %v79_v13 = vld [vmem:[%s4428_s2 + $0x58] sm:$0xff]  ;;  %v3642_v14 = vpack.c.bf16 %v74_v11, %v72_v10  ;;  %v76_v16 = vld [vmem:[%s4428_s2 + $0x40] sm:$0xff]  ;;  %v78_v17 = vld [vmem:[%s4428_s2 + $0x50] sm:$0xff] }
   0x5   :  { %2794 = vmatpush1.bf16.msra.mxu0 %v3624_v8  ;;  %v3645_v15 = vpack.c.bf16 %v79_v13, %v77_v12  ;;  %v81_v18 = vld [vmem:[%s4428_s2 + $0x68] sm:$0xff]  ;;  %v83_v19 = vld [vmem:[%s4428_s2 + $0x78] sm:$0xff]  ;;  %v3660_v20 = vpack.c.bf16 %v78_v17, %v76_v16  ;;  %v80_v22 = vld [vmem:[%s4428_s2 + $0x60] sm:$0xff] }
   0x6   :  { %2796 = vmatprep.subr.bf16.mxu0 %v3626_v9  ;;  %v3663_v21 = vpack.c.bf16 %v83_v19, %v81_v18  ;;  %v82_v23 = vld [vmem:[%s4428_s2 + $0x70] sm:$0xff]  ;;  %v85_v24 = vld [vmem:[%s4428_s2 + $0x88] sm:$0xff]  ;;  %v87_v25 = vld [vmem:[%s4428_s2 + $0x98] sm:$0xff] }
   0x7   :  { %v3680_v26 = vld [vmem:[%s4429_s1 + $0x8] sm:$0xff]  ;;  %v3686_v27 = vld [vmem:[%s4429_s1] sm:$0xff]  ;;  %v3692_v29 = vpack.c.bf16 %v82_v23, %v80_v22  ;;  %v3696_v30 = vpack.c.bf16 %v87_v25, %v85_v24  ;;  %v86_v32 = vld [vmem:[%s4428_s2 + $0x90] sm:$0xff] }
   0x8   :  { %175 = vmatprep.subr.mxu1 %v3680_v26  ;;  %v65_v28 = vld [vmem:[%s4430_s0] sm:$0xff]  ;;  %v89_v33 = vld [vmem:[%s4428_s2 + $0xa8] sm:$0xff]  ;;  %v91_v34 = vld [vmem:[%s4428_s2 + $0xb8] sm:$0xff] }
   0x9   :  { %2798 = vmatpush1.bf16.msra.mxu0 %v3642_v14  ;;  %176 = vmatpush1.msra.mxu1 %v3686_v27  ;;  %v84_v31 = vld [vmem:[%s4428_s2 + $0x80] sm:$0xff]  ;;  %v3716_v36 = vpack.c.bf16 %v91_v34, %v89_v33  ;;  %v90_v38 = vld [vmem:[%s4428_s2 + $0xb0] sm:$0xff]  ;;  %v93_v39 = vld [vmem:[%s4428_s2 + $0xc8] sm:$0xff] }
   0xa   :  { %2800 = vmatprep.subr.bf16.mxu0 %v3645_v15  ;;  %2684 = vmatmul.mubr.msk.f32.vlgmr.msra.gmra.mrb[0].mxu1 %vm171_vm0, %v65_v28  ;;  %v3713_v35 = vpack.c.bf16 %v86_v32, %v84_v31  ;;  %v88_v37 = vld [vmem:[%s4428_s2 + $0xa0] sm:$0xff]  ;;  %v95_v40 = vld [vmem:[%s4428_s2 + $0xd8] sm:$0xff]  ;;  %v94_v44 = vld [vmem:[%s4428_s2 + $0xd0] sm:$0xff] }
   0xb   :  { %382 = vmatprep.mubr.f32.mxu1 %v3538_v3  ;;  %v3731_v41 = vpack.c.bf16 %v90_v38, %v88_v37  ;;  %v3734_v42 = vpack.c.bf16 %v95_v40, %v93_v39  ;;  %v92_v43 = vld [vmem:[%s4428_s2 + $0xc0] sm:$0xff]  ;;  %v97_v45 = vld [vmem:[%s4428_s2 + $0xe8] sm:$0xff]  ;;  %v99_v46 = vld [vmem:[%s4428_s2 + $0xf8] sm:$0xff] }
   0xc   :  { %v3749_v47 = vpack.c.bf16 %v94_v44, %v92_v43  ;;  %v3752_v48 = vpack.c.bf16 %v99_v46, %v97_v45  ;;  %v96_v49 = vld [vmem:[%s4428_s2 + $0xe0] sm:$0xff]  ;;  %v98_v50 = vld [vmem:[%s4428_s2 + $0xf0] sm:$0xff]  ;;  %s3539_s2 = smov 64   ;;  %v63_v59 = vld [vmem:[#allocation4] sm:$0xff] }
   0xd   :  { %2802 = vmatpush1.bf16.msra.mxu0 %v3660_v20  ;;  %v3761_v51 = vpack.c.bf16 %v98_v50, %v96_v49  ;;  %v62_v2 = vld [vmem:[#allocation3] sm:$0xff]  ;;  %v287_v5 = vld [vmem:[%s4431_s3 + $0x8] sm:$0xff]  ;;  %v289_v6 = vld [vmem:[%s4431_s3 + $0x18] sm:$0xff] }
   0xe   :  { %2804 = vmatprep.subr.bf16.mxu0 %v3663_v21  ;;  %v286_v7 = vld [vmem:[%s4431_s3] sm:$0xff]  ;;  %v3792_v10 = vpack.c.bf16 %v289_v6, %v287_v5  ;;  %v288_v11 = vld [vmem:[%s4431_s3 + $0x10] sm:$0xff]  ;;  %v291_v12 = vld [vmem:[%s4431_s3 + $0x28] sm:$0xff] }
   0xf   :  { %v293_v13 = vld [vmem:[%s4431_s3 + $0x38] sm:$0xff]  ;;  %v3803_v16 = vpack.c.bf16 %v288_v11, %v286_v7  ;;  %v290_v18 = vld [vmem:[%s4431_s3 + $0x20] sm:$0xff]  ;;  %v292_v19 = vld [vmem:[%s4431_s3 + $0x30] sm:$0xff] }
  0x10   :  { %v3805_v17 = vpack.c.bf16 %v293_v13, %v291_v12  ;;  %v295_v22 = vld [vmem:[%s4431_s3 + $0x48] sm:$0xff]  ;;  %2824 = vmatprep.subr.bf16.mxu1 %v3792_v10  ;;  %v297_v23 = vld [vmem:[%s4431_s3 + $0x58] sm:$0xff]  ;;  %v3822_v24 = vpack.c.bf16 %v292_v19, %v290_v18  ;;  %v294_v28 = vld [vmem:[%s4431_s3 + $0x40] sm:$0xff] }
  0x11   :  { %2806 = vmatpush1.bf16.msra.mxu0 %v3692_v29  ;;  %2826 = vmatpush1.bf16.msra.mxu1 %v3803_v16  ;;  %v3826_v25 = vpack.c.bf16 %v297_v23, %v295_v22  ;;  %v296_v31 = vld [vmem:[%s4431_s3 + $0x50] sm:$0xff]  ;;  %v299_v32 = vld [vmem:[%s4431_s3 + $0x68] sm:$0xff]  ;;  %v301_v33 = vld [vmem:[%s4431_s3 + $0x78] sm:$0xff] }
  0x12   :  { %2808 = vmatprep.subr.bf16.mxu0 %v3696_v30  ;;  %2828 = vmatprep.subr.bf16.mxu1 %v3805_v17  ;;  %v3842_v34 = vpack.c.bf16 %v296_v31, %v294_v28  ;;  %v3846_v37 = vpack.c.bf16 %v301_v33, %v299_v32  ;;  %v298_v38 = vld [vmem:[%s4431_s3 + $0x60] sm:$0xff]  ;;  %v300_v39 = vld [vmem:[%s4431_s3 + $0x70] sm:$0xff]  ;;  %v303_v40 = vld [vmem:[%s4431_s3 + $0x88] sm:$0xff] }
  0x13   :  { %v305_v43 = vld [vmem:[%s4431_s3 + $0x98] sm:$0xff]  ;;  %v3862_v44 = vpack.c.bf16 %v300_v39, %v298_v38  ;;  %v302_v46 = vld [vmem:[%s4431_s3 + $0x80] sm:$0xff]  ;;  %v304_v49 = vld [vmem:[%s4431_s3 + $0x90] sm:$0xff] }
  0x14   :  { %v3866_v45 = vpack.c.bf16 %v305_v43, %v303_v40  ;;  %v307_v50 = vld [vmem:[%s4431_s3 + $0xa8] sm:$0xff]  ;;  %v314_v7 = vld [vmem:[%s4431_s3 + $0xe0] sm:$0xff]  ;;  %v316_v11 = vld [vmem:[%s4431_s3 + $0xf0] sm:$0xff] }
  0x15   :  { %2810 = vmatpush1.bf16.msra.mxu0 %v3713_v35  ;;  %2830 = vmatpush1.bf16.msra.mxu1 %v3822_v24  ;;  %v3936_v12 = vpack.c.bf16 %v316_v11, %v314_v7  ;;  %v64_v28 = vld [vmem:[#allocation5] sm:$0xff] }
  0x16   :  { %2812 = vmatprep.subr.bf16.mxu0 %v3716_v36  ;;  %2832 = vmatprep.subr.bf16.mxu1 %v3826_v25 }
  0x19   :  { %2814 = vmatpush1.bf16.msra.mxu0 %v3731_v41  ;;  %2834 = vmatpush1.bf16.msra.mxu1 %v3842_v34 }
  0x1a   :  { %2816 = vmatprep.subr.bf16.mxu0 %v3734_v42  ;;  %2836 = vmatprep.subr.bf16.mxu1 %v3846_v37 }
  0x1d   :  { %2818 = vmatpush1.bf16.msra.mxu0 %v3749_v47  ;;  %2838 = vmatpush1.bf16.msra.mxu1 %v3862_v44 }
  0x1e   :  { %2820 = vmatprep.subr.bf16.mxu0 %v3752_v48  ;;  %2840 = vmatprep.subr.bf16.mxu1 %v3866_v45 }
  0x21   :  { %2822 = vmatpush1.bf16.msra.mxu0 %v3761_v51 }
  0x22   :  { %2888 = vmatprep.subr.bf16.mxu0 %v3792_v10 }
  0x24   :  { %165 = vmatmul.mubr.f32.vlgmr.msra.gmra.mrb[0].mxu0 %v3538_v3 }
  0x25   :  { %669 = vmatprep.mubr.f32.mxu0 %v3538_v3  ;;  %2890 = vmatpush1.bf16.msra.mxu0 %v3803_v16 }
  0x26   :  { %2892 = vmatprep.subr.bf16.mxu0 %v3805_v17 }
  0x29   :  { %2894 = vmatpush1.bf16.msra.mxu0 %v3822_v24 }
  0x2a   :  { %2896 = vmatprep.subr.bf16.mxu0 %v3826_v25 }
  0x2d   :  { %2898 = vmatpush1.bf16.msra.mxu0 %v3842_v34 }
  0x2e   :  { %2900 = vmatprep.subr.bf16.mxu0 %v3846_v37 }
  0x31   :  { %2902 = vmatpush1.bf16.msra.mxu0 %v3862_v44 }
  0x32   :  { %2904 = vmatprep.subr.bf16.mxu0 %v3866_v45 }
  0xdd   :  { %v241_v52 = vpop.f32.mrb[0].mxu1 }
  0xde   :  { %v243_v53 = vpop.f32.mrb[1].mxu1 }
  0xf7   :  { %v166_v54 = vpop.f32.mrb[0].mxu0 }
  0xf8   :  { %v242_v55 = vadd.f32 %v241_v52, %v166_v54  ;;  %v168_v56 = vpop.f32.mrb[1].mxu0  ;;  %v309_v52 = vld [vmem:[%s4431_s3 + $0xb8] sm:$0xff] }
  0xf9   :  { %v3773_v57 = vadd.f32 %v243_v53, %v168_v56  ;;  %v3882_v53 = vpack.c.bf16 %v304_v49, %v302_v46  ;;  %v3886_v54 = vpack.c.bf16 %v309_v52, %v307_v50  ;;  %v308_v56 = vld [vmem:[%s4431_s3 + $0xb0] sm:$0xff]  ;;  %v51_v46 = vlaneseq  ;;  %v49_v52 = vld [vmem:[%s4432_s4] sm:$0x3] }
  0xfa   :  { %v2685_v60 = vmul.f32 -1.442695, %v242_v55  ;;  %v306_v55 = vld [vmem:[%s4431_s3 + $0xa0] sm:$0xff] }
  0xfb   :  { %3344 = vtanh.f32 %v3773_v57  ;;  %2842 = vmatpush1.bf16.msra.mxu1 %v3882_v53  ;;  %2906 = vmatpush1.bf16.msra.mxu0 %v3882_v53  ;;  %v2686_v31 = vmul.f32 -1.442695, %v3773_v57  ;;  %v2689_v57 = vld [vmem:[%s4430_s0 + $0x8] sm:$0xff]  ;;  %v52_v49 = vshrl.u32 %v51_v46, 7 }
  0xfc   :  { %3346 = vpow2.f32 %v2685_v60  ;;  %v3902_v60 = vpack.c.bf16 %v308_v56, %v306_v55  ;;  %2844 = vmatprep.subr.bf16.mxu1 %v3886_v54  ;;  %2908 = vmatprep.subr.bf16.mxu0 %v3886_v54 }
  0xfd   :  { %v57_v50 = vsub.s32 1, %v52_v49  ;;  %v53_v7 = vsub.s32 0, %v52_v49 }
  0xff   :  { %2846 = vmatpush1.bf16.msra.mxu1 %v3902_v60  ;;  %2910 = vmatpush1.bf16.msra.mxu0 %v3902_v60  ;;  %v3997_v55 = vrot.slane %v49_v52, %v57_v50  ;;  %v4002_v11 = vrot.slane %v49_v52, %v53_v7 }
 0x105   :  { %v3345_v58 = vpop.eup %3344 }
 0x106   :  { %265 = vrot.lane.b32.xlu0 %v3345_v58, %s3539_s2  ;;  %v3347_v61 = vpop.eup %3346  ;;  %v311_v58 = vld [vmem:[%s4431_s3 + $0xc8] sm:$0xff] }
 0x107   :  { %v252_v62 = vadd.f32 1.0, %v3347_v61 }
 0x109   :  { %3348 = vrcp.f32 %v252_v62  ;;  %v310_v62 = vld [vmem:[%s4431_s3 + $0xc0] sm:$0xff] }
 0x10a   :  { %260 = vrot.lane.b32.xlu0 %v63_v59, %s3539_s2  ;;  %v313_v59 = vld [vmem:[%s4431_s3 + $0xd8] sm:$0xff] }
 0x10b   :  { %v3906_v61 = vpack.c.bf16 %v313_v59, %v311_v58 }
 0x10d   :  { %2848 = vmatprep.subr.bf16.mxu1 %v3906_v61  ;;  %2912 = vmatprep.subr.bf16.mxu0 %v3906_v61 }
 0x10e   :  { %281 = vrot.lane.b32.xlu0 %v62_v2, %s3539_s2  ;;  %v317_v2 = vld [vmem:[%s4431_s3 + $0xf8] sm:$0xff] }
 0x112   :  { %403 = vrot.lane.b32.xlu0 %v64_v28, %s3539_s2 }
 0x113   :  { %v3778_v63 = vpop.eup %3348 }
 0x178   :  { %v266_v0 = vpop.permute.xlu0 %265 }
 0x179   :  { %v268_v1 = vmul.f32 %v3778_v63, %v266_v0  ;;  %v312_v0 = vld [vmem:[%s4431_s3 + $0xd0] sm:$0xff] }
 0x17a   :  { %v3922_v5 = vpack.c.bf16 %v312_v0, %v310_v62 }
 0x17b   :  { %270 = vrot.lane.b32.xlu1 %v268_v1, %s3539_s2  ;;  %v315_v1 = vld [vmem:[%s4431_s3 + $0xe8] sm:$0xff] }
 0x17c   :  { %v3926_v6 = vpack.c.bf16 %v317_v2, %v315_v1  ;;  %2850 = vmatpush1.bf16.msra.mxu1 %v3922_v5  ;;  %2914 = vmatpush1.bf16.msra.mxu0 %v3922_v5  ;;  %v261_v13 = vpop.permute.xlu0 %260 }
 0x17d   :  { %v263_v18 = vmul.f32 %v3778_v63, %v261_v13 }
 0x17e   :  { %2852 = vmatprep.subr.bf16.mxu1 %v3926_v6  ;;  %2916 = vmatprep.subr.bf16.mxu0 %v3926_v6 }
 0x180   :  { %2854 = vmatpush1.bf16.msra.mxu1 %v3936_v12  ;;  %2918 = vmatpush1.bf16.msra.mxu0 %v3936_v12  ;;  %v282_v63 = vpop.permute.xlu0 %281 }
 0x181   :  { %2856 = vmatprep.subr.bf16.mxu1 %v3613_v4  ;;  %2920 = vmatprep.subr.bf16.mxu0 %v3613_v4 }
 0x1ed   :  { %v271_v19 = vpop.permute.xlu1 %270 }
 0x1ee   :  { %v3946_v22 = vadd.f32 %v271_v19, %v263_v18 }
 0x1f0   :  { %3350 = vtanh.f32 %v3946_v22 }
 0x1f1   :  { %3352 = vpow2.f32 %v2686_v31 }
 0x1fa   :  { %v3351_v23 = vpop.eup %3350 }
 0x1fb   :  { %276 = vrot.lane.b32.xlu1 %v3351_v23, %s3539_s2  ;;  %v3353_v32 = vpop.eup %3352 }
 0x1fc   :  { %v253_v33 = vadd.f32 1.0, %v3353_v32 }
 0x1fe   :  { %3354 = vrcp.f32 %v253_v33 }
 0x208   :  { %v3355_v38 = vpop.eup %3354 }
 0x26d   :  { %v277_v39 = vpop.permute.xlu1 %276 }
 0x26e   :  { %v279_v40 = vmul.f32 %v3355_v38, %v277_v39 }
 0x270   :  { %v285_v43 = vsel %vm45_vm1, %v279_v40, %v282_v63 }
 0x271   :  { %383 = vmatmul.mubr.f32.vlgmr.msra.gmra.mrb[2].mxu1 %v285_v43 }
 0x272   :  { %2858 = vmatpush1.bf16.msra.mxu1 %v3624_v8  ;;  %489 = vmatprep.mubr.f32.mxu1 %v3538_v3 }
 0x273   :  { %2860 = vmatprep.subr.bf16.mxu1 %v3626_v9 }
 0x276   :  { %2862 = vmatpush1.bf16.msra.mxu1 %v3642_v14 }
 0x277   :  { %2864 = vmatprep.subr.bf16.mxu1 %v3645_v15 }
 0x27a   :  { %2866 = vmatpush1.bf16.msra.mxu1 %v3660_v20 }
 0x27b   :  { %2868 = vmatprep.subr.bf16.mxu1 %v3663_v21 }
 0x27e   :  { %2870 = vmatpush1.bf16.msra.mxu1 %v3692_v29 }
 0x27f   :  { %2872 = vmatprep.subr.bf16.mxu1 %v3696_v30 }
 0x282   :  { %2874 = vmatpush1.bf16.msra.mxu1 %v3713_v35 }
 0x283   :  { %2876 = vmatprep.subr.bf16.mxu1 %v3716_v36 }
 0x286   :  { %2878 = vmatpush1.bf16.msra.mxu1 %v3731_v41 }
 0x287   :  { %2880 = vmatprep.subr.bf16.mxu1 %v3734_v42 }
 0x28a   :  { %2882 = vmatpush1.bf16.msra.mxu1 %v3749_v47 }
 0x28b   :  { %2884 = vmatprep.subr.bf16.mxu1 %v3752_v48 }
 0x28e   :  { %2886 = vmatpush1.bf16.msra.mxu1 %v3761_v51 }
 0x28f   :  { %499 = vmatprep.subr.mxu1 %v3680_v26 }
 0x291   :  { %490 = vmatmul.mubr.f32.vlgmr.msra.gmra.mrb[4].mxu1 %v285_v43 }
 0x292   :  { %500 = vmatpush1.msra.mxu1 %v3686_v27  ;;  %563 = vmatprep.mubr.f32.mxu1 %v3538_v3 }
 0x293   :  { %2952 = vmatprep.subr.bf16.mxu1 %v3792_v10 }
 0x299   :  { %2690 = vmatmul.mubr.msk.f32.vlgmr.msra.gmra.mrb[4].mxu1 %vm171_vm0, %v2689_v57  ;;  %v404_v57 = vpop.permute.xlu0 %403 }
 0x29a   :  { %2954 = vmatpush1.bf16.msra.mxu1 %v3803_v16  ;;  %952 = vmatprep.mubr.f32.mxu1 %v3538_v3 }
 0x29b   :  { %2956 = vmatprep.subr.bf16.mxu1 %v3805_v17 }
 0x29e   :  { %2958 = vmatpush1.bf16.msra.mxu1 %v3822_v24 }
 0x29f   :  { %2960 = vmatprep.subr.bf16.mxu1 %v3826_v25 }
 0x2a2   :  { %2962 = vmatpush1.bf16.msra.mxu1 %v3842_v34 }
 0x2a3   :  { %2964 = vmatprep.subr.bf16.mxu1 %v3846_v37 }
 0x2a6   :  { %2966 = vmatpush1.bf16.msra.mxu1 %v3862_v44 }
 0x2a7   :  { %2968 = vmatprep.subr.bf16.mxu1 %v3866_v45 }
 0x2aa   :  { %2970 = vmatpush1.bf16.msra.mxu1 %v3882_v53 }
 0x2ab   :  { %2972 = vmatprep.subr.bf16.mxu1 %v3886_v54 }
 0x2ae   :  { %2974 = vmatpush1.bf16.msra.mxu1 %v3902_v60 }
 0x2af   :  { %2976 = vmatprep.subr.bf16.mxu1 %v3906_v61 }
 0x2b2   :  { %2978 = vmatpush1.bf16.msra.mxu1 %v3922_v5 }
 0x2b3   :  { %2980 = vmatprep.subr.bf16.mxu1 %v3926_v6 }
 0x2b6   :  { %2982 = vmatpush1.bf16.msra.mxu1 %v3936_v12 }
 0x2b7   :  { %2984 = vmatprep.subr.bf16.mxu1 %v3613_v4 }
 0x344   :  { %v384_v56 = vpop.f32.mrb[2].mxu1 }
 0x345   :  { %v386_v58 = vpop.f32.mrb[3].mxu1  ;;  %v385_v13 = vadd.f32 %v384_v56, %v4002_v11 }
 0x346   :  { %v387_v59 = vadd.f32 %v386_v58, %v3997_v55 }
 0x347   :  { %v2687_v18 = vmul.f32 -1.442695, %v385_v13 }
 0x348   :  { %3356 = vtanh.f32 %v387_v59 }
 0x352   :  { %v3357_v62 = vpop.eup %3356 }
 0x353   :  { %408 = vrot.lane.b32.xlu1 %v3357_v62, %s3539_s2 }
 0x36c   :  { %v565_v0 = vpop.f32.mrb[4].mxu1 }
 0x36d   :  { %v567_v1 = vpop.f32.mrb[5].mxu1  ;;  %v2691_v33 = vmul.f32 -1.442695, %v565_v0 }
 0x36e   :  { %3358 = vtanh.f32 %v567_v1 }
 0x36f   :  { %3360 = vpow2.f32 %v2687_v18 }
 0x378   :  { %v3359_v2 = vpop.eup %3358 }
 0x379   :  { %585 = vrot.lane.b32.xlu1 %v3359_v2, %s3539_s2  ;;  %v3361_v19 = vpop.eup %3360  ;;  %v2688_v2 = vmul.f32 -1.442695, %v387_v59 }
 0x37a   :  { %v395_v23 = vadd.f32 1.0, %v3361_v19 }
 0x37c   :  { %3362 = vrcp.f32 %v395_v23 }
 0x37d   :  { %3364 = vpow2.f32 %v2691_v33 }
 0x386   :  { %v3363_v28 = vpop.eup %3362 }
 0x387   :  { %v3365_v38 = vpop.eup %3364  ;;  %v406_v46 = vmul.f32 %v3363_v28, %v404_v57 }
 0x388   :  { %v576_v39 = vadd.f32 1.0, %v3365_v38 }
 0x38a   :  { %3366 = vrcp.f32 %v576_v39 }
 0x394   :  { %v3367_v63 = vpop.eup %3366 }
 0x395   :  { %v583_v56 = vmul.f32 %v3367_v63, %v3946_v22 }
 0x3c5   :  { %v409_v31 = vpop.permute.xlu1 %408 }
 0x3c6   :  { %v411_v32 = vmul.f32 %v3363_v28, %v409_v31  ;;  %v2692_v28 = vmul.f32 -1.442695, %v567_v1  ;;  %v2695_v1 = vld [vmem:[%s4430_s0 + $0x10] sm:$0xff] }
 0x3c8   :  { %413 = vrot.lane.b32.xlu0 %v411_v32, %s3539_s2 }
 0x3eb   :  { %v586_v40 = vpop.permute.xlu1 %585 }
 0x3ec   :  { %v588_v43 = vmul.f32 %v3367_v63, %v586_v40 }
 0x3ee   :  { %590 = vrot.lane.b32.xlu1 %v588_v43, %s3539_s2 }
 0x43a   :  { %v414_v49 = vpop.permute.xlu0 %413 }
 0x43b   :  { %v4007_v50 = vadd.f32 %v414_v49, %v406_v46 }
 0x43d   :  { %3368 = vtanh.f32 %v4007_v50 }
 0x447   :  { %v3369_v52 = vpop.eup %3368 }
 0x448   :  { %419 = vrot.lane.b32.xlu0 %v3369_v52, %s3539_s2 }
 0x460   :  { %v591_v58 = vpop.permute.xlu1 %590 }
 0x461   :  { %v4012_v62 = vadd.f32 %v591_v58, %v583_v56 }
 0x463   :  { %3370 = vtanh.f32 %v4012_v62 }
 0x464   :  { %3372 = vpow2.f32 %v2688_v2 }
 0x46d   :  { %v3371_v0 = vpop.eup %3370 }
 0x46e   :  { %596 = vrot.lane.b32.xlu1 %v3371_v0, %s3539_s2  ;;  %v3373_v7 = vpop.eup %3372 }
 0x46f   :  { %v396_v13 = vadd.f32 1.0, %v3373_v7 }
 0x471   :  { %3374 = vrcp.f32 %v396_v13 }
 0x472   :  { %3376 = vpow2.f32 %v2692_v28 }
 0x47b   :  { %v3375_v18 = vpop.eup %3374 }
 0x47c   :  { %v3377_v22 = vpop.eup %3376 }
 0x47d   :  { %v577_v31 = vadd.f32 1.0, %v3377_v22 }
 0x47f   :  { %3378 = vrcp.f32 %v577_v31 }
 0x489   :  { %v3379_v33 = vpop.eup %3378 }
 0x4ba   :  { %v420_v19 = vpop.permute.xlu0 %419 }
 0x4bb   :  { %v422_v23 = vmul.f32 %v3375_v18, %v420_v19 }
 0x4bd   :  { %601 = vrot.lane.b32.xlu0 %v422_v23, %s3539_s2 }
 0x4e0   :  { %v597_v32 = vpop.permute.xlu1 %596 }
 0x4e1   :  { %v599_v38 = vmul.f32 %v3379_v33, %v597_v32 }
 0x52f   :  { %v602_v39 = vpop.permute.xlu0 %601 }
 0x530   :  { %v604_v59 = vsel %vm45_vm1, %v599_v38, %v602_v39 }
 0x531   :  { %670 = vmatmul.mubr.f32.vlgmr.msra.gmra.mrb[2].mxu0 %v604_v59 }
 0x532   :  { %2922 = vmatpush1.bf16.msra.mxu0 %v3624_v8  ;;  %772 = vmatprep.mubr.f32.mxu0 %v3538_v3 }
 0x533   :  { %2924 = vmatprep.subr.bf16.mxu0 %v3626_v9 }
 0x536   :  { %2926 = vmatpush1.bf16.msra.mxu0 %v3642_v14 }
 0x537   :  { %2928 = vmatprep.subr.bf16.mxu0 %v3645_v15 }
 0x53a   :  { %2930 = vmatpush1.bf16.msra.mxu0 %v3660_v20 }
 0x53b   :  { %2932 = vmatprep.subr.bf16.mxu0 %v3663_v21 }
 0x53e   :  { %2934 = vmatpush1.bf16.msra.mxu0 %v3692_v29 }
 0x53f   :  { %2936 = vmatprep.subr.bf16.mxu0 %v3696_v30 }
 0x542   :  { %2938 = vmatpush1.bf16.msra.mxu0 %v3713_v35 }
 0x543   :  { %2940 = vmatprep.subr.bf16.mxu0 %v3716_v36 }
 0x546   :  { %2942 = vmatpush1.bf16.msra.mxu0 %v3731_v41 }
 0x547   :  { %2944 = vmatprep.subr.bf16.mxu0 %v3734_v42 }
 0x54a   :  { %2946 = vmatpush1.bf16.msra.mxu0 %v3749_v47 }
 0x54b   :  { %2948 = vmatprep.subr.bf16.mxu0 %v3752_v48 }
 0x54e   :  { %2950 = vmatpush1.bf16.msra.mxu0 %v3761_v51 }
 0x54f   :  { %782 = vmatprep.subr.mxu0 %v3680_v26 }
 0x551   :  { %773 = vmatmul.mubr.f32.vlgmr.msra.gmra.mrb[4].mxu0 %v604_v59 }
 0x552   :  { %783 = vmatpush1.msra.mxu0 %v3686_v27  ;;  %846 = vmatprep.mubr.f32.mxu0 %v3538_v3 }
 0x553   :  { %3016 = vmatprep.subr.bf16.mxu0 %v3792_v10 }
 0x559   :  { %2696 = vmatmul.mubr.msk.f32.vlgmr.msra.gmra.mrb[4].mxu0 %vm171_vm0, %v2695_v1 }
 0x55a   :  { %3018 = vmatpush1.bf16.msra.mxu0 %v3803_v16  ;;  %1235 = vmatprep.mubr.f32.mxu0 %v3538_v3 }
 0x55b   :  { %3020 = vmatprep.subr.bf16.mxu0 %v3805_v17 }
 0x55e   :  { %3022 = vmatpush1.bf16.msra.mxu0 %v3822_v24 }
 0x55f   :  { %3024 = vmatprep.subr.bf16.mxu0 %v3826_v25 }
 0x562   :  { %3026 = vmatpush1.bf16.msra.mxu0 %v3842_v34 }
 0x563   :  { %3028 = vmatprep.subr.bf16.mxu0 %v3846_v37 }
 0x566   :  { %3030 = vmatpush1.bf16.msra.mxu0 %v3862_v44 }
 0x567   :  { %3032 = vmatprep.subr.bf16.mxu0 %v3866_v45 }
 0x56a   :  { %3034 = vmatpush1.bf16.msra.mxu0 %v3882_v53 }
 0x56b   :  { %3036 = vmatprep.subr.bf16.mxu0 %v3886_v54 }
 0x56e   :  { %3038 = vmatpush1.bf16.msra.mxu0 %v3902_v60 }
 0x56f   :  { %3040 = vmatprep.subr.bf16.mxu0 %v3906_v61 }
 0x572   :  { %3042 = vmatpush1.bf16.msra.mxu0 %v3922_v5 }
 0x573   :  { %3044 = vmatprep.subr.bf16.mxu0 %v3926_v6 }
 0x576   :  { %3046 = vmatpush1.bf16.msra.mxu0 %v3936_v12 }
 0x577   :  { %3048 = vmatprep.subr.bf16.mxu0 %v3613_v4 }
 0x604   :  { %v671_v63 = vpop.f32.mrb[2].mxu0 }
 0x605   :  { %v673_v40 = vpop.f32.mrb[3].mxu0  ;;  %v672_v56 = vadd.f32 %v671_v63, %v4002_v11 }
 0x606   :  { %v674_v43 = vadd.f32 %v673_v40, %v3997_v55 }
 0x607   :  { %v2693_v58 = vmul.f32 -1.442695, %v672_v56 }
 0x608   :  { %3380 = vtanh.f32 %v674_v43 }
 0x612   :  { %v3381_v57 = vpop.eup %3380 }
 0x613   :  { %691 = vrot.lane.b32.xlu1 %v3381_v57, %s3539_s2 }
 0x62c   :  { %v848_v46 = vpop.f32.mrb[4].mxu0 }
 0x62d   :  { %v850_v49 = vpop.f32.mrb[5].mxu0  ;;  %v2697_v19 = vmul.f32 -1.442695, %v848_v46  ;;  %v2694_v46 = vmul.f32 -1.442695, %v674_v43 }
 0x62e   :  { %3382 = vtanh.f32 %v850_v49 }
 0x62f   :  { %3384 = vpow2.f32 %v2693_v58 }
 0x638   :  { %v3383_v52 = vpop.eup %3382 }
 0x639   :  { %868 = vrot.lane.b32.xlu0 %v3383_v52, %s3539_s2  ;;  %v3385_v0 = vpop.eup %3384 }
 0x63a   :  { %v682_v2 = vadd.f32 1.0, %v3385_v0 }
 0x63c   :  { %3386 = vrcp.f32 %v682_v2  ;;  %v2698_v2 = vmul.f32 -1.442695, %v850_v49  ;;  %v2701_v49 = vld [vmem:[%s4430_s0 + $0x18] sm:$0xff] }
 0x63d   :  { %3388 = vpow2.f32 %v2697_v19 }
 0x646   :  { %v3387_v7 = vpop.eup %3386 }
 0x647   :  { %v3389_v23 = vpop.eup %3388  ;;  %v689_v33 = vmul.f32 %v3387_v7, %v4007_v50 }
 0x648   :  { %v859_v28 = vadd.f32 1.0, %v3389_v23 }
 0x64a   :  { %3390 = vrcp.f32 %v859_v28 }
 0x654   :  { %v3391_v22 = vpop.eup %3390 }
 0x655   :  { %v866_v1 = vmul.f32 %v3391_v22, %v4012_v62 }
 0x685   :  { %v692_v13 = vpop.permute.xlu1 %691 }
 0x686   :  { %v694_v18 = vmul.f32 %v3387_v7, %v692_v13 }
 0x688   :  { %696 = vrot.lane.b32.xlu1 %v694_v18, %s3539_s2 }
 0x6ab   :  { %v869_v31 = vpop.permute.xlu0 %868 }
 0x6ac   :  { %v871_v32 = vmul.f32 %v3391_v22, %v869_v31 }
 0x6ae   :  { %873 = vrot.lane.b32.xlu0 %v871_v32, %s3539_s2 }
 0x6fa   :  { %v697_v38 = vpop.permute.xlu1 %696 }
 0x6fb   :  { %v4066_v39 = vadd.f32 %v697_v38, %v689_v33 }
 0x6fd   :  { %3392 = vtanh.f32 %v4066_v39 }
 0x707   :  { %v3393_v59 = vpop.eup %3392 }
 0x708   :  { %702 = vrot.lane.b32.xlu1 %v3393_v59, %s3539_s2 }
 0x720   :  { %v874_v63 = vpop.permute.xlu0 %873 }
 0x721   :  { %v4071_v40 = vadd.f32 %v874_v63, %v866_v1 }
 0x723   :  { %3394 = vtanh.f32 %v4071_v40 }
 0x724   :  { %3396 = vpow2.f32 %v2694_v46 }
 0x72d   :  { %v3395_v57 = vpop.eup %3394 }
 0x72e   :  { %879 = vrot.lane.b32.xlu0 %v3395_v57, %s3539_s2  ;;  %v3397_v50 = vpop.eup %3396 }
 0x72f   :  { %v683_v52 = vadd.f32 1.0, %v3397_v50 }
 0x731   :  { %3398 = vrcp.f32 %v683_v52 }
 0x732   :  { %3400 = vpow2.f32 %v2698_v2 }
 0x73b   :  { %v3399_v56 = vpop.eup %3398 }
 0x73c   :  { %v3401_v62 = vpop.eup %3400 }
 0x73d   :  { %v860_v7 = vadd.f32 1.0, %v3401_v62 }
 0x73f   :  { %3402 = vrcp.f32 %v860_v7 }
 0x749   :  { %v3403_v18 = vpop.eup %3402 }
 0x77a   :  { %v703_v58 = vpop.permute.xlu1 %702 }
 0x77b   :  { %v705_v0 = vmul.f32 %v3399_v56, %v703_v58 }
 0x77d   :  { %884 = vrot.lane.b32.xlu1 %v705_v0, %s3539_s2 }
 0x7a0   :  { %v880_v13 = vpop.permute.xlu0 %879 }
 0x7a1   :  { %v882_v19 = vmul.f32 %v3403_v18, %v880_v13 }
 0x7ef   :  { %v885_v23 = vpop.permute.xlu1 %884 }
 0x7f0   :  { %v887_v43 = vsel %vm45_vm1, %v882_v19, %v885_v23 }
 0x7f1   :  { %953 = vmatmul.mubr.f32.vlgmr.msra.gmra.mrb[6].mxu1 %v887_v43 }
 0x7f2   :  { %2986 = vmatpush1.bf16.msra.mxu1 %v3624_v8  ;;  %1055 = vmatprep.mubr.f32.mxu1 %v3538_v3 }
 0x7f3   :  { %2988 = vmatprep.subr.bf16.mxu1 %v3626_v9 }
 0x7f6   :  { %2990 = vmatpush1.bf16.msra.mxu1 %v3642_v14 }
 0x7f7   :  { %2992 = vmatprep.subr.bf16.mxu1 %v3645_v15 }
 0x7fa   :  { %2994 = vmatpush1.bf16.msra.mxu1 %v3660_v20 }
 0x7fb   :  { %2996 = vmatprep.subr.bf16.mxu1 %v3663_v21 }
 0x7fe   :  { %2998 = vmatpush1.bf16.msra.mxu1 %v3692_v29 }
 0x7ff   :  { %3000 = vmatprep.subr.bf16.mxu1 %v3696_v30 }
 0x802   :  { %3002 = vmatpush1.bf16.msra.mxu1 %v3713_v35 }
 0x803   :  { %3004 = vmatprep.subr.bf16.mxu1 %v3716_v36 }
 0x806   :  { %3006 = vmatpush1.bf16.msra.mxu1 %v3731_v41 }
 0x807   :  { %3008 = vmatprep.subr.bf16.mxu1 %v3734_v42 }
 0x80a   :  { %3010 = vmatpush1.bf16.msra.mxu1 %v3749_v47 }
 0x80b   :  { %3012 = vmatprep.subr.bf16.mxu1 %v3752_v48 }
 0x80e   :  { %3014 = vmatpush1.bf16.msra.mxu1 %v3761_v51 }
 0x80f   :  { %1065 = vmatprep.subr.mxu1 %v3680_v26 }
 0x811   :  { %1056 = vmatmul.mubr.f32.vlgmr.msra.gmra.mrb[8].mxu1 %v887_v43 }
 0x812   :  { %1066 = vmatpush1.msra.mxu1 %v3686_v27  ;;  %1129 = vmatprep.mubr.f32.mxu1 %v3538_v3 }
 0x813   :  { %3080 = vmatprep.subr.bf16.mxu1 %v3792_v10 }
 0x819   :  { %2702 = vmatmul.mubr.msk.f32.vlgmr.msra.gmra.mrb[8].mxu1 %vm171_vm0, %v2701_v49 }
 0x81a   :  { %3082 = vmatpush1.bf16.msra.mxu1 %v3803_v16  ;;  %1518 = vmatprep.mubr.f32.mxu1 %v3538_v3 }
 0x81b   :  { %3084 = vmatprep.subr.bf16.mxu1 %v3805_v17 }
 0x81e   :  { %3086 = vmatpush1.bf16.msra.mxu1 %v3822_v24 }
 0x81f   :  { %3088 = vmatprep.subr.bf16.mxu1 %v3826_v25 }
 0x822   :  { %3090 = vmatpush1.bf16.msra.mxu1 %v3842_v34 }
 0x823   :  { %3092 = vmatprep.subr.bf16.mxu1 %v3846_v37 }
 0x826   :  { %3094 = vmatpush1.bf16.msra.mxu1 %v3862_v44 }
 0x827   :  { %3096 = vmatprep.subr.bf16.mxu1 %v3866_v45 }
 0x82a   :  { %3098 = vmatpush1.bf16.msra.mxu1 %v3882_v53 }
 0x82b   :  { %3100 = vmatprep.subr.bf16.mxu1 %v3886_v54 }
 0x82e   :  { %3102 = vmatpush1.bf16.msra.mxu1 %v3902_v60 }
 0x82f   :  { %3104 = vmatprep.subr.bf16.mxu1 %v3906_v61 }
 0x832   :  { %3106 = vmatpush1.bf16.msra.mxu1 %v3922_v5 }
 0x833   :  { %3108 = vmatprep.subr.bf16.mxu1 %v3926_v6 }
 0x836   :  { %3110 = vmatpush1.bf16.msra.mxu1 %v3936_v12 }
 0x837   :  { %3112 = vmatprep.subr.bf16.mxu1 %v3613_v4 }
 0x8c4   :  { %v954_v28 = vpop.f32.mrb[6].mxu1 }
 0x8c5   :  { %v956_v22 = vpop.f32.mrb[7].mxu1  ;;  %v955_v1 = vadd.f32 %v954_v28, %v4002_v11 }
 0x8c6   :  { %v957_v31 = vadd.f32 %v956_v22, %v3997_v55 }
 0x8c7   :  { %v2699_v63 = vmul.f32 -1.442695, %v955_v1 }
 0x8c8   :  { %3404 = vtanh.f32 %v957_v31 }
 0x8d2   :  { %v3405_v32 = vpop.eup %3404 }
 0x8d3   :  { %974 = vrot.lane.b32.xlu0 %v3405_v32, %s3539_s2 }
 0x8ec   :  { %v1131_v33 = vpop.f32.mrb[8].mxu1 }
 0x8ed   :  { %v1133_v38 = vpop.f32.mrb[9].mxu1  ;;  %v2703_v58 = vmul.f32 -1.442695, %v1131_v33  ;;  %v2700_v33 = vmul.f32 -1.442695, %v957_v31 }
 0x8ee   :  { %3406 = vtanh.f32 %v1133_v38 }
 0x8ef   :  { %3408 = vpow2.f32 %v2699_v63 }
 0x8f8   :  { %v3407_v59 = vpop.eup %3406 }
 0x8f9   :  { %1151 = vrot.lane.b32.xlu1 %v3407_v59, %s3539_s2  ;;  %v3409_v57 = vpop.eup %3408 }
 0x8fa   :  { %v965_v46 = vadd.f32 1.0, %v3409_v57 }
 0x8fc   :  { %3410 = vrcp.f32 %v965_v46  ;;  %v2704_v46 = vmul.f32 -1.442695, %v1133_v38  ;;  %v2707_v38 = vld [vmem:[%s4430_s0 + $0x20] sm:$0xff] }
 0x8fd   :  { %3412 = vpow2.f32 %v2703_v58 }
 0x906   :  { %v3411_v50 = vpop.eup %3410 }
 0x907   :  { %v3413_v0 = vpop.eup %3412  ;;  %v972_v18 = vmul.f32 %v3411_v50, %v4066_v39 }
 0x908   :  { %v1142_v2 = vadd.f32 1.0, %v3413_v0 }
 0x90a   :  { %3414 = vrcp.f32 %v1142_v2 }
 0x914   :  { %v3415_v62 = vpop.eup %3414 }
 0x915   :  { %v1149_v49 = vmul.f32 %v3415_v62, %v4071_v40 }
 0x945   :  { %v975_v52 = vpop.permute.xlu0 %974 }
 0x946   :  { %v977_v56 = vmul.f32 %v3411_v50, %v975_v52 }
 0x948   :  { %979 = vrot.lane.b32.xlu0 %v977_v56, %s3539_s2 }
 0x96b   :  { %v1152_v7 = vpop.permute.xlu1 %1151 }
 0x96c   :  { %v1154_v13 = vmul.f32 %v3415_v62, %v1152_v7 }
 0x96e   :  { %1156 = vrot.lane.b32.xlu1 %v1154_v13, %s3539_s2 }
 0x9ba   :  { %v980_v19 = vpop.permute.xlu0 %979 }
 0x9bb   :  { %v4125_v23 = vadd.f32 %v980_v19, %v972_v18 }
 0x9bd   :  { %3416 = vtanh.f32 %v4125_v23 }
 0x9c7   :  { %v3417_v43 = vpop.eup %3416 }
 0x9c8   :  { %985 = vrot.lane.b32.xlu0 %v3417_v43, %s3539_s2 }
 0x9e0   :  { %v1157_v28 = vpop.permute.xlu1 %1156 }
 0x9e1   :  { %v4130_v22 = vadd.f32 %v1157_v28, %v1149_v49 }
 0x9e3   :  { %3418 = vtanh.f32 %v4130_v22 }
 0x9e4   :  { %3420 = vpow2.f32 %v2700_v33 }
 0x9ed   :  { %v3419_v32 = vpop.eup %3418 }
 0x9ee   :  { %1162 = vrot.lane.b32.xlu1 %v3419_v32, %s3539_s2  ;;  %v3421_v39 = vpop.eup %3420 }
 0x9ef   :  { %v966_v59 = vadd.f32 1.0, %v3421_v39 }
 0x9f1   :  { %3422 = vrcp.f32 %v966_v59 }
 0x9f2   :  { %3424 = vpow2.f32 %v2704_v46 }
 0x9fb   :  { %v3423_v1 = vpop.eup %3422 }
 0x9fc   :  { %v3425_v40 = vpop.eup %3424 }
 0x9fd   :  { %v1143_v50 = vadd.f32 1.0, %v3425_v40 }
 0x9ff   :  { %3426 = vrcp.f32 %v1143_v50 }
 0xa09   :  { %v3427_v56 = vpop.eup %3426 }
 0xa3a   :  { %v986_v63 = vpop.permute.xlu0 %985 }
 0xa3b   :  { %v988_v57 = vmul.f32 %v3423_v1, %v986_v63 }
 0xa3d   :  { %1167 = vrot.lane.b32.xlu0 %v988_v57, %s3539_s2 }
 0xa60   :  { %v1163_v52 = vpop.permute.xlu1 %1162 }
 0xa61   :  { %v1165_v58 = vmul.f32 %v3427_v56, %v1163_v52 }
 0xaaf   :  { %v1168_v0 = vpop.permute.xlu0 %1167 }
 0xab0   :  { %v1170_v31 = vsel %vm45_vm1, %v1165_v58, %v1168_v0 }
 0xab1   :  { %1236 = vmatmul.mubr.f32.vlgmr.msra.gmra.mrb[6].mxu0 %v1170_v31 }
 0xab2   :  { %3050 = vmatpush1.bf16.msra.mxu0 %v3624_v8  ;;  %1338 = vmatprep.mubr.f32.mxu0 %v3538_v3 }
 0xab3   :  { %3052 = vmatprep.subr.bf16.mxu0 %v3626_v9 }
 0xab6   :  { %3054 = vmatpush1.bf16.msra.mxu0 %v3642_v14 }
 0xab7   :  { %3056 = vmatprep.subr.bf16.mxu0 %v3645_v15 }
 0xaba   :  { %3058 = vmatpush1.bf16.msra.mxu0 %v3660_v20 }
 0xabb   :  { %3060 = vmatprep.subr.bf16.mxu0 %v3663_v21 }
 0xabe   :  { %3062 = vmatpush1.bf16.msra.mxu0 %v3692_v29 }
 0xabf   :  { %3064 = vmatprep.subr.bf16.mxu0 %v3696_v30 }
 0xac2   :  { %3066 = vmatpush1.bf16.msra.mxu0 %v3713_v35 }
 0xac3   :  { %3068 = vmatprep.subr.bf16.mxu0 %v3716_v36 }
 0xac6   :  { %3070 = vmatpush1.bf16.msra.mxu0 %v3731_v41 }
 0xac7   :  { %3072 = vmatprep.subr.bf16.mxu0 %v3734_v42 }
 0xaca   :  { %3074 = vmatpush1.bf16.msra.mxu0 %v3749_v47 }
 0xacb   :  { %3076 = vmatprep.subr.bf16.mxu0 %v3752_v48 }
 0xace   :  { %3078 = vmatpush1.bf16.msra.mxu0 %v3761_v51 }
 0xacf   :  { %1348 = vmatprep.subr.mxu0 %v3680_v26 }
 0xad1   :  { %1339 = vmatmul.mubr.f32.vlgmr.msra.gmra.mrb[8].mxu0 %v1170_v31 }
 0xad2   :  { %1349 = vmatpush1.msra.mxu0 %v3686_v27  ;;  %1412 = vmatprep.mubr.f32.mxu0 %v3538_v3 }
 0xad3   :  { %3144 = vmatprep.subr.bf16.mxu0 %v3792_v10 }
 0xad9   :  { %2708 = vmatmul.mubr.msk.f32.vlgmr.msra.gmra.mrb[8].mxu0 %vm171_vm0, %v2707_v38 }
 0xada   :  { %3146 = vmatpush1.bf16.msra.mxu0 %v3803_v16  ;;  %1801 = vmatprep.mubr.f32.mxu0 %v3538_v3 }
 0xadb   :  { %3148 = vmatprep.subr.bf16.mxu0 %v3805_v17 }
 0xade   :  { %3150 = vmatpush1.bf16.msra.mxu0 %v3822_v24 }
 0xadf   :  { %3152 = vmatprep.subr.bf16.mxu0 %v3826_v25 }
 0xae2   :  { %3154 = vmatpush1.bf16.msra.mxu0 %v3842_v34 }
 0xae3   :  { %3156 = vmatprep.subr.bf16.mxu0 %v3846_v37 }
 0xae6   :  { %3158 = vmatpush1.bf16.msra.mxu0 %v3862_v44 }
 0xae7   :  { %3160 = vmatprep.subr.bf16.mxu0 %v3866_v45 }
 0xaea   :  { %3162 = vmatpush1.bf16.msra.mxu0 %v3882_v53 }
 0xaeb   :  { %3164 = vmatprep.subr.bf16.mxu0 %v3886_v54 }
 0xaee   :  { %3166 = vmatpush1.bf16.msra.mxu0 %v3902_v60 }
 0xaef   :  { %3168 = vmatprep.subr.bf16.mxu0 %v3906_v61 }
 0xaf2   :  { %3170 = vmatpush1.bf16.msra.mxu0 %v3922_v5 }
 0xaf3   :  { %3172 = vmatprep.subr.bf16.mxu0 %v3926_v6 }
 0xaf6   :  { %3174 = vmatpush1.bf16.msra.mxu0 %v3936_v12 }
 0xaf7   :  { %3176 = vmatprep.subr.bf16.mxu0 %v3613_v4 }
 0xb84   :  { %v1237_v26 = vpop.f32.mrb[6].mxu0 }
 0xb85   :  { %v1239_v27 = vpop.f32.mrb[7].mxu0  ;;  %v1238_v19 = vadd.f32 %v1237_v26, %v4002_v11 }
 0xb86   :  { %v1240_v2 = vadd.f32 %v1239_v27, %v3997_v55 }
 0xb87   :  { %v2705_v43 = vmul.f32 -1.442695, %v1238_v19 }
 0xb88   :  { %3428 = vtanh.f32 %v1240_v2  ;;  %v2706_v27 = vmul.f32 -1.442695, %v1240_v2 }
 0xb92   :  { %v3429_v62 = vpop.eup %3428 }
 0xb93   :  { %1257 = vrot.lane.b32.xlu1 %v3429_v62, %s3539_s2 }
 0xbac   :  { %v1414_v7 = vpop.f32.mrb[8].mxu0 }
 0xbad   :  { %v1416_v13 = vpop.f32.mrb[9].mxu0  ;;  %v2709_v59 = vmul.f32 -1.442695, %v1414_v7 }
 0xbae   :  { %3430 = vtanh.f32 %v1416_v13 }
 0xbaf   :  { %3432 = vpow2.f32 %v2705_v43  ;;  %v2710_v43 = vmul.f32 -1.442695, %v1416_v13  ;;  %v4214_v13 = vld [vmem:[%s4429_s1 + $0x8] sm:$0xff] }
 0xbb8   :  { %v3431_v18 = vpop.eup %3430 }
 0xbb9   :  { %1434 = vrot.lane.b32.xlu0 %v3431_v18, %s3539_s2  ;;  %v3433_v49 = vpop.eup %3432 }
 0xbba   :  { %v1248_v28 = vadd.f32 1.0, %v3433_v49 }
 0xbbc   :  { %3434 = vrcp.f32 %v1248_v28 }
 0xbbd   :  { %3436 = vpow2.f32 %v2709_v59  ;;  %v4220_v59 = vld [vmem:[%s4429_s1] sm:$0xff] }
 0xbc6   :  { %v3435_v32 = vpop.eup %3434 }
 0xbc7   :  { %v3437_v1 = vpop.eup %3436  ;;  %v1255_v50 = vmul.f32 %v3435_v32, %v4125_v23 }
 0xbc8   :  { %v1425_v63 = vadd.f32 1.0, %v3437_v1  ;;  %v2713_v1 = vld [vmem:[%s4430_s0 + $0x28] sm:$0xff] }
 0xbca   :  { %3438 = vrcp.f32 %v1425_v63 }
 0xbd4   :  { %v3439_v57 = vpop.eup %3438 }
 0xbd5   :  { %v1432_v0 = vmul.f32 %v3439_v57, %v4130_v22 }
 0xc05   :  { %v1258_v33 = vpop.permute.xlu1 %1257 }
 0xc06   :  { %v1260_v39 = vmul.f32 %v3435_v32, %v1258_v33 }
 0xc08   :  { %1262 = vrot.lane.b32.xlu1 %v1260_v39, %s3539_s2 }
 0xc2b   :  { %v1435_v46 = vpop.permute.xlu0 %1434 }
 0xc2c   :  { %v1437_v40 = vmul.f32 %v3439_v57, %v1435_v46 }
 0xc2e   :  { %1439 = vrot.lane.b32.xlu0 %v1437_v40, %s3539_s2 }
 0xc7a   :  { %v1263_v52 = vpop.permute.xlu1 %1262 }
 0xc7b   :  { %v4184_v56 = vadd.f32 %v1263_v52, %v1255_v50 }
 0xc7d   :  { %3440 = vtanh.f32 %v4184_v56 }
 0xc87   :  { %v3441_v58 = vpop.eup %3440 }
 0xc88   :  { %1268 = vrot.lane.b32.xlu1 %v3441_v58, %s3539_s2 }
 0xca0   :  { %v1440_v31 = vpop.permute.xlu0 %1439 }
 0xca1   :  { %v4189_v38 = vadd.f32 %v1440_v31, %v1432_v0 }
 0xca3   :  { %3442 = vtanh.f32 %v4189_v38 }
 0xca4   :  { %3444 = vpow2.f32 %v2706_v27 }
 0xcad   :  { %v3443_v26 = vpop.eup %3442 }
 0xcae   :  { %1445 = vrot.lane.b32.xlu0 %v3443_v26, %s3539_s2  ;;  %v3445_v23 = vpop.eup %3444 }
 0xcaf   :  { %v1249_v62 = vadd.f32 1.0, %v3445_v23 }
 0xcb1   :  { %3446 = vrcp.f32 %v1249_v62 }
 0xcb2   :  { %3448 = vpow2.f32 %v2710_v43 }
 0xcbb   :  { %v3447_v7 = vpop.eup %3446 }
 0xcbc   :  { %v3449_v22 = vpop.eup %3448 }
 0xcbd   :  { %v1426_v49 = vadd.f32 1.0, %v3449_v22 }
 0xcbf   :  { %3450 = vrcp.f32 %v1426_v49 }
 0xcc9   :  { %v3451_v32 = vpop.eup %3450 }
 0xcfa   :  { %v1269_v18 = vpop.permute.xlu1 %1268 }
 0xcfb   :  { %v1271_v19 = vmul.f32 %v3447_v7, %v1269_v18 }
 0xcfd   :  { %1450 = vrot.lane.b32.xlu1 %v1271_v19, %s3539_s2 }
 0xd20   :  { %v1446_v28 = vpop.permute.xlu0 %1445 }
 0xd21   :  { %v1448_v33 = vmul.f32 %v3451_v32, %v1446_v28 }
 0xd6f   :  { %v1451_v39 = vpop.permute.xlu1 %1450 }
 0xd70   :  { %v1453_v2 = vsel %vm45_vm1, %v1448_v33, %v1451_v39 }
 0xd71   :  { %1519 = vmatmul.mubr.f32.vlgmr.msra.gmra.mrb[10].mxu1 %v1453_v2 }
 0xd72   :  { %3114 = vmatpush1.bf16.msra.mxu1 %v3624_v8  ;;  %1621 = vmatprep.mubr.f32.mxu1 %v3538_v3 }
 0xd73   :  { %3116 = vmatprep.subr.bf16.mxu1 %v3626_v9 }
 0xd76   :  { %3118 = vmatpush1.bf16.msra.mxu1 %v3642_v14 }
 0xd77   :  { %3120 = vmatprep.subr.bf16.mxu1 %v3645_v15 }
 0xd7a   :  { %3122 = vmatpush1.bf16.msra.mxu1 %v3660_v20 }
 0xd7b   :  { %3124 = vmatprep.subr.bf16.mxu1 %v3663_v21 }
 0xd7e   :  { %3126 = vmatpush1.bf16.msra.mxu1 %v3692_v29 }
 0xd7f   :  { %3128 = vmatprep.subr.bf16.mxu1 %v3696_v30 }
 0xd82   :  { %3130 = vmatpush1.bf16.msra.mxu1 %v3713_v35 }
 0xd83   :  { %3132 = vmatprep.subr.bf16.mxu1 %v3716_v36 }
 0xd86   :  { %3134 = vmatpush1.bf16.msra.mxu1 %v3731_v41 }
 0xd87   :  { %3136 = vmatprep.subr.bf16.mxu1 %v3734_v42 }
 0xd8a   :  { %3138 = vmatpush1.bf16.msra.mxu1 %v3749_v47 }
 0xd8b   :  { %3140 = vmatprep.subr.bf16.mxu1 %v3752_v48 }
 0xd8e   :  { %3142 = vmatpush1.bf16.msra.mxu1 %v3761_v51 }
 0xd8f   :  { %1631 = vmatprep.subr.mxu1 %v4214_v13 }
 0xd91   :  { %1622 = vmatmul.mubr.f32.vlgmr.msra.gmra.mrb[12].mxu1 %v1453_v2 }
 0xd92   :  { %1632 = vmatpush1.msra.mxu1 %v4220_v59  ;;  %1695 = vmatprep.mubr.f32.mxu1 %v3538_v3 }
 0xd93   :  { %3208 = vmatprep.subr.bf16.mxu1 %v3792_v10 }
 0xd99   :  { %2714 = vmatmul.mubr.msk.f32.vlgmr.msra.gmra.mrb[12].mxu1 %vm171_vm0, %v2713_v1 }
 0xd9a   :  { %3210 = vmatpush1.bf16.msra.mxu1 %v3803_v16  ;;  %2084 = vmatprep.mubr.f32.mxu1 %v3538_v3 }
 0xd9b   :  { %3212 = vmatprep.subr.bf16.mxu1 %v3805_v17 }
 0xd9e   :  { %3214 = vmatpush1.bf16.msra.mxu1 %v3822_v24 }
 0xd9f   :  { %3216 = vmatprep.subr.bf16.mxu1 %v3826_v25 }
 0xda2   :  { %3218 = vmatpush1.bf16.msra.mxu1 %v3842_v34 }
 0xda3   :  { %3220 = vmatprep.subr.bf16.mxu1 %v3846_v37 }
 0xda6   :  { %3222 = vmatpush1.bf16.msra.mxu1 %v3862_v44 }
 0xda7   :  { %3224 = vmatprep.subr.bf16.mxu1 %v3866_v45 }
 0xdaa   :  { %3226 = vmatpush1.bf16.msra.mxu1 %v3882_v53 }
 0xdab   :  { %3228 = vmatprep.subr.bf16.mxu1 %v3886_v54 }
 0xdae   :  { %3230 = vmatpush1.bf16.msra.mxu1 %v3902_v60 }
 0xdaf   :  { %3232 = vmatprep.subr.bf16.mxu1 %v3906_v61 }
 0xdb2   :  { %3234 = vmatpush1.bf16.msra.mxu1 %v3922_v5 }
 0xdb3   :  { %3236 = vmatprep.subr.bf16.mxu1 %v3926_v6 }
 0xdb6   :  { %3238 = vmatpush1.bf16.msra.mxu1 %v3936_v12 }
 0xdb7   :  { %3240 = vmatprep.subr.bf16.mxu1 %v3613_v4 }
 0xe44   :  { %v1520_v63 = vpop.f32.mrb[10].mxu1 }
 0xe45   :  { %v1522_v57 = vpop.f32.mrb[11].mxu1  ;;  %v1521_v0 = vadd.f32 %v1520_v63, %v4002_v11 }
 0xe46   :  { %v1523_v46 = vadd.f32 %v1522_v57, %v3997_v55 }
 0xe47   :  { %v2711_v31 = vmul.f32 -1.442695, %v1521_v0 }
 0xe48   :  { %3452 = vtanh.f32 %v1523_v46 }
 0xe52   :  { %v3453_v40 = vpop.eup %3452 }
 0xe53   :  { %1540 = vrot.lane.b32.xlu0 %v3453_v40, %s3539_s2  ;;  %v2712_v40 = vmul.f32 -1.442695, %v1523_v46 }
 0xe6c   :  { %v1697_v50 = vpop.f32.mrb[12].mxu1 }
 0xe6d   :  { %v1699_v52 = vpop.f32.mrb[13].mxu1  ;;  %v2715_v7 = vmul.f32 -1.442695, %v1697_v50 }
 0xe6e   :  { %3454 = vtanh.f32 %v1699_v52 }
 0xe6f   :  { %3456 = vpow2.f32 %v2711_v31 }
 0xe78   :  { %v3455_v58 = vpop.eup %3454 }
 0xe79   :  { %1717 = vrot.lane.b32.xlu1 %v3455_v58, %s3539_s2  ;;  %v3457_v26 = vpop.eup %3456 }
 0xe7a   :  { %v1531_v4 = vadd.f32 1.0, %v3457_v26  ;;  %v2716_v26 = vmul.f32 -1.442695, %v1699_v52  ;;  %v2719_v52 = vld [vmem:[%s4430_s0 + $0x30] sm:$0xff] }
 0xe7c   :  { %3458 = vrcp.f32 %v1531_v4 }
 0xe7d   :  { %3460 = vpow2.f32 %v2715_v7 }
 0xe86   :  { %v3459_v27 = vpop.eup %3458 }
 0xe87   :  { %v3461_v18 = vpop.eup %3460  ;;  %v1538_v28 = vmul.f32 %v3459_v27, %v4184_v56 }
 0xe88   :  { %v1708_v19 = vadd.f32 1.0, %v3461_v18 }
 0xe8a   :  { %3462 = vrcp.f32 %v1708_v19 }
 0xe94   :  { %v3463_v43 = vpop.eup %3462 }
 0xe95   :  { %v1715_v2 = vmul.f32 %v3463_v43, %v4189_v38 }
 0xec5   :  { %v1541_v23 = vpop.permute.xlu0 %1540 }
 0xec6   :  { %v1543_v62 = vmul.f32 %v3459_v27, %v1541_v23 }
 0xec8   :  { %1545 = vrot.lane.b32.xlu0 %v1543_v62, %s3539_s2 }
 0xeeb   :  { %v1718_v22 = vpop.permute.xlu1 %1717 }
 0xeec   :  { %v1720_v49 = vmul.f32 %v3463_v43, %v1718_v22 }
 0xeee   :  { %1722 = vrot.lane.b32.xlu1 %v1720_v49, %s3539_s2 }
 0xf3a   :  { %v1546_v32 = vpop.permute.xlu0 %1545 }
 0xf3b   :  { %v4253_v33 = vadd.f32 %v1546_v32, %v1538_v28 }
 0xf3d   :  { %3464 = vtanh.f32 %v4253_v33 }
 0xf47   :  { %v3465_v39 = vpop.eup %3464 }
 0xf48   :  { %1551 = vrot.lane.b32.xlu0 %v3465_v39, %s3539_s2 }
 0xf60   :  { %v1723_v1 = vpop.permute.xlu1 %1722 }
 0xf61   :  { %v4258_v63 = vadd.f32 %v1723_v1, %v1715_v2 }
 0xf63   :  { %3466 = vtanh.f32 %v4258_v63 }
 0xf64   :  { %3468 = vpow2.f32 %v2712_v40 }
 0xf6d   :  { %v3467_v57 = vpop.eup %3466 }
 0xf6e   :  { %1728 = vrot.lane.b32.xlu1 %v3467_v57, %s3539_s2  ;;  %v3469_v56 = vpop.eup %3468 }
 0xf6f   :  { %v1532_v50 = vadd.f32 1.0, %v3469_v56 }
 0xf71   :  { %3470 = vrcp.f32 %v1532_v50 }
 0xf72   :  { %3472 = vpow2.f32 %v2716_v26 }
 0xf7b   :  { %v3471_v58 = vpop.eup %3470 }
 0xf7c   :  { %v3473_v38 = vpop.eup %3472 }
 0xf7d   :  { %v1709_v4 = vadd.f32 1.0, %v3473_v38 }
 0xf7f   :  { %3474 = vrcp.f32 %v1709_v4 }
 0xf89   :  { %v3475_v23 = vpop.eup %3474 }
 0xfba   :  { %v1552_v0 = vpop.permute.xlu0 %1551 }
 0xfbb   :  { %v1554_v31 = vmul.f32 %v3471_v58, %v1552_v0 }
 0xfbd   :  { %1733 = vrot.lane.b32.xlu0 %v1554_v31, %s3539_s2 }
 0xfe0   :  { %v1729_v27 = vpop.permute.xlu1 %1728 }
 0xfe1   :  { %v1731_v62 = vmul.f32 %v3475_v23, %v1729_v27 }
0x102f   :  { %v1734_v7 = vpop.permute.xlu0 %1733 }
0x1030   :  { %v1736_v46 = vsel %vm45_vm1, %v1731_v62, %v1734_v7 }
0x1031   :  { %1802 = vmatmul.mubr.f32.vlgmr.msra.gmra.mrb[10].mxu0 %v1736_v46 }
0x1032   :  { %3178 = vmatpush1.bf16.msra.mxu0 %v3624_v8  ;;  %1904 = vmatprep.mubr.f32.mxu0 %v3538_v3 }
0x1033   :  { %3180 = vmatprep.subr.bf16.mxu0 %v3626_v9 }
0x1036   :  { %3182 = vmatpush1.bf16.msra.mxu0 %v3642_v14 }
0x1037   :  { %3184 = vmatprep.subr.bf16.mxu0 %v3645_v15 }
0x103a   :  { %3186 = vmatpush1.bf16.msra.mxu0 %v3660_v20 }
0x103b   :  { %3188 = vmatprep.subr.bf16.mxu0 %v3663_v21 }
0x103e   :  { %3190 = vmatpush1.bf16.msra.mxu0 %v3692_v29 }
0x103f   :  { %3192 = vmatprep.subr.bf16.mxu0 %v3696_v30 }
0x1042   :  { %3194 = vmatpush1.bf16.msra.mxu0 %v3713_v35 }
0x1043   :  { %3196 = vmatprep.subr.bf16.mxu0 %v3716_v36 }
0x1046   :  { %3198 = vmatpush1.bf16.msra.mxu0 %v3731_v41 }
0x1047   :  { %3200 = vmatprep.subr.bf16.mxu0 %v3734_v42 }
0x104a   :  { %3202 = vmatpush1.bf16.msra.mxu0 %v3749_v47 }
0x104b   :  { %3204 = vmatprep.subr.bf16.mxu0 %v3752_v48 }
0x104e   :  { %3206 = vmatpush1.bf16.msra.mxu0 %v3761_v51 }
0x104f   :  { %1914 = vmatprep.subr.mxu0 %v4214_v13 }
0x1051   :  { %1905 = vmatmul.mubr.f32.vlgmr.msra.gmra.mrb[12].mxu0 %v1736_v46 }
0x1052   :  { %1915 = vmatpush1.msra.mxu0 %v4220_v59  ;;  %1978 = vmatprep.mubr.f32.mxu0 %v3538_v3 }
0x1053   :  { %3272 = vmatprep.subr.bf16.mxu0 %v3792_v10 }
0x1059   :  { %2720 = vmatmul.mubr.msk.f32.vlgmr.msra.gmra.mrb[12].mxu0 %vm171_vm0, %v2719_v52 }
0x105a   :  { %3274 = vmatpush1.bf16.msra.mxu0 %v3803_v16  ;;  %2367 = vmatprep.mubr.f32.mxu0 %v3538_v3 }
0x105b   :  { %3276 = vmatprep.subr.bf16.mxu0 %v3805_v17 }
0x105e   :  { %3278 = vmatpush1.bf16.msra.mxu0 %v3822_v24 }
0x105f   :  { %3280 = vmatprep.subr.bf16.mxu0 %v3826_v25 }
0x1062   :  { %3282 = vmatpush1.bf16.msra.mxu0 %v3842_v34 }
0x1063   :  { %3284 = vmatprep.subr.bf16.mxu0 %v3846_v37 }
0x1066   :  { %3286 = vmatpush1.bf16.msra.mxu0 %v3862_v44 }
0x1067   :  { %3288 = vmatprep.subr.bf16.mxu0 %v3866_v45 }
0x106a   :  { %3290 = vmatpush1.bf16.msra.mxu0 %v3882_v53 }
0x106b   :  { %3292 = vmatprep.subr.bf16.mxu0 %v3886_v54 }
0x106e   :  { %3294 = vmatpush1.bf16.msra.mxu0 %v3902_v60 }
0x106f   :  { %3296 = vmatprep.subr.bf16.mxu0 %v3906_v61 }
0x1072   :  { %3298 = vmatpush1.bf16.msra.mxu0 %v3922_v5 }
0x1073   :  { %3300 = vmatprep.subr.bf16.mxu0 %v3926_v6 }
0x1076   :  { %3302 = vmatpush1.bf16.msra.mxu0 %v3936_v12 }
0x1104   :  { %v1803_v10 = vpop.f32.mrb[10].mxu0 }
0x1105   :  { %v1805_v16 = vpop.f32.mrb[11].mxu0  ;;  %v1804_v44 = vadd.f32 %v1803_v10, %v4002_v11 }
0x1106   :  { %v1806_v17 = vadd.f32 %v1805_v16, %v3997_v55 }
0x1107   :  { %v2717_v45 = vmul.f32 -1.442695, %v1804_v44 }
0x1108   :  { %3476 = vtanh.f32 %v1806_v17  ;;  %v2718_v56 = vmul.f32 -1.442695, %v1806_v17 }
0x1112   :  { %v3477_v24 = vpop.eup %3476 }
0x1113   :  { %1823 = vrot.lane.b32.xlu1 %v3477_v24, %s3539_s2 }
0x112c   :  { %v1980_v25 = vpop.f32.mrb[12].mxu0 }
0x112d   :  { %v1982_v34 = vpop.f32.mrb[13].mxu0  ;;  %v2721_v6 = vmul.f32 -1.442695, %v1980_v25 }
0x112e   :  { %3478 = vtanh.f32 %v1982_v34  ;;  %v2722_v26 = vmul.f32 -1.442695, %v1982_v34 }
0x112f   :  { %3480 = vpow2.f32 %v2717_v45 }
0x1138   :  { %v3479_v37 = vpop.eup %3478 }
0x1139   :  { %2000 = vrot.lane.b32.xlu0 %v3479_v37, %s3539_s2  ;;  %v3481_v53 = vpop.eup %3480 }
0x113a   :  { %v1814_v54 = vadd.f32 1.0, %v3481_v53 }
0x113c   :  { %3482 = vrcp.f32 %v1814_v54 }
0x113d   :  { %3484 = vpow2.f32 %v2721_v6 }
0x1146   :  { %v3483_v60 = vpop.eup %3482 }
0x1147   :  { %v3485_v12 = vpop.eup %3484  ;;  %v1821_v49 = vmul.f32 %v3483_v60, %v4253_v33 }
0x1148   :  { %v1991_v18 = vadd.f32 1.0, %v3485_v12 }
0x114a   :  { %3486 = vrcp.f32 %v1991_v18 }
0x1154   :  { %v3487_v19 = vpop.eup %3486 }
0x1155   :  { %v1998_v2 = vmul.f32 %v3487_v19, %v4258_v63 }
0x1185   :  { %v1824_v61 = vpop.permute.xlu1 %1823 }
0x1186   :  { %v1826_v5 = vmul.f32 %v3483_v60, %v1824_v61 }
0x1188   :  { %1828 = vrot.lane.b32.xlu1 %v1826_v5, %s3539_s2 }
0x11ab   :  { %v2001_v43 = vpop.permute.xlu0 %2000 }
0x11ac   :  { %v2003_v22 = vmul.f32 %v3487_v19, %v2001_v43 }
0x11ae   :  { %2005 = vrot.lane.b32.xlu0 %v2003_v22, %s3539_s2 }
0x11fa   :  { %v1829_v28 = vpop.permute.xlu1 %1828 }
0x11fb   :  { %v4311_v32 = vadd.f32 %v1829_v28, %v1821_v49 }
0x11fd   :  { %3488 = vtanh.f32 %v4311_v32 }
0x1207   :  { %v3489_v39 = vpop.eup %3488 }
0x1208   :  { %1834 = vrot.lane.b32.xlu1 %v3489_v39, %s3539_s2 }
0x1220   :  { %v2006_v1 = vpop.permute.xlu0 %2005 }
0x1221   :  { %v4316_v57 = vadd.f32 %v2006_v1, %v1998_v2 }
0x1223   :  { %3490 = vtanh.f32 %v4316_v57 }
0x1224   :  { %3492 = vpow2.f32 %v2718_v56 }
0x122d   :  { %v3491_v40 = vpop.eup %3490 }
0x122e   :  { %2011 = vrot.lane.b32.xlu0 %v3491_v40, %s3539_s2  ;;  %v3493_v33 = vpop.eup %3492 }
0x122f   :  { %v1815_v50 = vadd.f32 1.0, %v3493_v33 }
0x1231   :  { %3494 = vrcp.f32 %v1815_v50 }
0x1232   :  { %3496 = vpow2.f32 %v2722_v26 }
0x123b   :  { %v3495_v58 = vpop.eup %3494 }
0x123c   :  { %v3497_v63 = vpop.eup %3496 }
0x123d   :  { %v1992_v38 = vadd.f32 1.0, %v3497_v63  ;;  %v3540_v63 = vmov 0.0|0.0  }
0x123e   :  { %3303 = vmatprep.subr.bf16.mxu0 %v3540_v63 }
0x123f   :  { %3498 = vrcp.f32 %v1992_v38  ;;  %v2422_v38 = vld [vmem:[%s4433_s5 + $0x10] sm:$0xff] }
0x1249   :  { %v3499_v27 = vpop.eup %3498 }
0x127a   :  { %v1835_v0 = vpop.permute.xlu1 %1834 }
0x127b   :  { %v1837_v31 = vmul.f32 %v3495_v58, %v1835_v0 }
0x127d   :  { %2016 = vrot.lane.b32.xlu1 %v1837_v31, %s3539_s2 }
0x12a0   :  { %v2012_v4 = vpop.permute.xlu0 %2011 }
0x12a1   :  { %v2014_v23 = vmul.f32 %v3499_v27, %v2012_v4  ;;  %v2423_v27 = vld [vmem:[%s4433_s5 + $0x18] sm:$0xff] }
0x12ef   :  { %v2017_v62 = vpop.permute.xlu1 %2016 }
0x12f0   :  { %v2019_v7 = vsel %vm45_vm1, %v2014_v23, %v2017_v62  ;;  %v3307_v23 = vpack.c.bf16 %v2423_v27, %v2422_v38 }
0x12f1   :  { %2085 = vmatmul.mubr.f32.vlgmr.msra.gmra.mrb[14].mxu1 %v2019_v7 }
0x12f2   :  { %3242 = vmatpush1.bf16.msra.mxu1 %v3624_v8  ;;  %2187 = vmatprep.mubr.f32.mxu1 %v3538_v3  ;;  %v2725_v8 = vld [vmem:[%s4430_s0 + $0x38] sm:$0xff] }
0x12f3   :  { %3244 = vmatprep.subr.bf16.mxu1 %v3626_v9 }
0x12f6   :  { %3246 = vmatpush1.bf16.msra.mxu1 %v3642_v14 }
0x12f7   :  { %3248 = vmatprep.subr.bf16.mxu1 %v3645_v15 }
0x12fa   :  { %3250 = vmatpush1.bf16.msra.mxu1 %v3660_v20 }
0x12fb   :  { %3252 = vmatprep.subr.bf16.mxu1 %v3663_v21 }
0x12fe   :  { %3254 = vmatpush1.bf16.msra.mxu1 %v3692_v29 }
0x12ff   :  { %3256 = vmatprep.subr.bf16.mxu1 %v3696_v30 }
0x1302   :  { %3258 = vmatpush1.bf16.msra.mxu1 %v3713_v35 }
0x1303   :  { %3260 = vmatprep.subr.bf16.mxu1 %v3716_v36 }
0x1306   :  { %3262 = vmatpush1.bf16.msra.mxu1 %v3731_v41 }
0x1307   :  { %3264 = vmatprep.subr.bf16.mxu1 %v3734_v42 }
0x130a   :  { %3266 = vmatpush1.bf16.msra.mxu1 %v3749_v47 }
0x130b   :  { %3268 = vmatprep.subr.bf16.mxu1 %v3752_v48 }
0x130e   :  { %3270 = vmatpush1.bf16.msra.mxu1 %v3761_v51 }
0x130f   :  { %2197 = vmatprep.subr.mxu1 %v4214_v13 }
0x1311   :  { %2188 = vmatmul.mubr.f32.vlgmr.msra.gmra.mrb[16].mxu1 %v2019_v7 }
0x1312   :  { %2198 = vmatpush1.msra.mxu1 %v4220_v59  ;;  %2261 = vmatprep.mubr.f32.mxu1 %v3538_v3 }
0x1313   :  { %3315 = vmatprep.subr.bf16.mxu1 %v3540_v63 }
0x1319   :  { %2726 = vmatmul.mubr.msk.f32.vlgmr.msra.gmra.mrb[16].mxu1 %vm171_vm0, %v2725_v8 }
0x131a   :  { %2781 = vmatprep.mubr.msk.f32.mxu1 %vm3541_vm2, %v3538_v3 }
0x13c4   :  { %v2086_v9 = vpop.f32.mrb[14].mxu1 }
0x13c5   :  { %v2088_v14 = vpop.f32.mrb[15].mxu1  ;;  %v2087_v35 = vadd.f32 %v2086_v9, %v4002_v11  ;;  %v2424_v9 = vld [vmem:[%s4433_s5 + $0x20] sm:$0xff] }
0x13c6   :  { %v2089_v15 = vadd.f32 %v2088_v14, %v3997_v55  ;;  %v2425_v14 = vld [vmem:[%s4433_s5 + $0x28] sm:$0xff] }
0x13c7   :  { %v2723_v36 = vmul.f32 -1.442695, %v2087_v35  ;;  %v2509_v35 = vld [vmem:[%s4434_s7] sm:$0xff] }
0x13c8   :  { %3500 = vtanh.f32 %v2089_v15  ;;  %v2724_v54 = vmul.f32 -1.442695, %v2089_v15  ;;  %v3310_v15 = vpack.c.bf16 %v2425_v14, %v2424_v9 }
0x13d2   :  { %v3501_v20 = vpop.eup %3500 }
0x13d3   :  { %2106 = vrot.lane.b32.xlu0 %v3501_v20, %s3539_s2 }
0x13ec   :  { %v2263_v21 = vpop.f32.mrb[16].mxu1 }
0x13ed   :  { %v2265_v29 = vpop.f32.mrb[17].mxu1  ;;  %v2727_v13 = vmul.f32 -1.442695, %v2263_v21  ;;  %v2426_v21 = vld [vmem:[%s4433_s5 + $0x30] sm:$0xff] }
0x13ee   :  { %3502 = vtanh.f32 %v2265_v29  ;;  %v2728_v18 = vmul.f32 -1.442695, %v2265_v29  ;;  %v2427_v29 = vld [vmem:[%s4433_s5 + $0x38] sm:$0xff] }
0x13ef   :  { %3504 = vpow2.f32 %v2723_v36  ;;  %v2510_v36 = vld [vmem:[%s4434_s7 + $0x8] sm:$0xff] }
0x13f8   :  { %v3503_v30 = vpop.eup %3502 }
0x13f9   :  { %2283 = vrot.lane.b32.xlu1 %v3503_v30, %s3539_s2  ;;  %v3505_v41 = vpop.eup %3504  ;;  %v3313_v30 = vpack.c.bf16 %v2427_v29, %v2426_v21 }
0x13fa   :  { %v2097_v42 = vadd.f32 1.0, %v3505_v41 }
0x13fc   :  { %3506 = vrcp.f32 %v2097_v42  ;;  %v3316_v42 = vpack.c.bf16 %v2510_v36, %v2509_v35 }
0x13fd   :  { %3508 = vpow2.f32 %v2727_v13 }
0x13fe   :  { %3317 = vmatpush3.bf16.msra.mxu1 %v3316_v42 }
0x13ff   :  { %3318 = vmatprep.subr.bf16.mxu1 %v3540_v63 }
0x1406   :  { %v3507_v47 = vpop.eup %3506 }
0x1407   :  { %v3509_v59 = vpop.eup %3508  ;;  %v2104_v17 = vmul.f32 %v3507_v47, %v4311_v32 }
0x1408   :  { %v2274_v46 = vadd.f32 1.0, %v3509_v59 }
0x140a   :  { %3510 = vrcp.f32 %v2274_v46 }
0x1414   :  { %v3511_v52 = vpop.eup %3510 }
0x1415   :  { %v2281_v37 = vmul.f32 %v3511_v52, %v4316_v57 }
0x1445   :  { %v2107_v48 = vpop.permute.xlu0 %2106 }
0x1446   :  { %v2109_v51 = vmul.f32 %v3507_v47, %v2107_v48 }
0x1448   :  { %2111 = vrot.lane.b32.xlu0 %v2109_v51, %s3539_s2 }
0x146b   :  { %v2284_v10 = vpop.permute.xlu1 %2283 }
0x146c   :  { %v2286_v16 = vmul.f32 %v3511_v52, %v2284_v10 }
0x146e   :  { %2288 = vrot.lane.b32.xlu1 %v2286_v16, %s3539_s2  ;;  %v2511_v16 = vld [vmem:[%s4434_s7 + $0x10] sm:$0xff] }
0x14ba   :  { %v2112_v24 = vpop.permute.xlu0 %2111 }
0x14bb   :  { %v2114_v25 = vadd.f32 %v2112_v24, %v2104_v17  ;;  %v2512_v17 = vld [vmem:[%s4434_s7 + $0x18] sm:$0xff] }
0x14bc   :  { %v3319_v24 = vpack.c.bf16 %v2512_v17, %v2511_v16 }
0x14bd   :  { %3512 = vtanh.f32 %v2114_v25 }
0x14be   :  { %3320 = vmatpush3.bf16.msra.mxu1 %v3319_v24 }
0x14bf   :  { %3321 = vmatprep.subr.bf16.mxu1 %v3540_v63 }
0x14c7   :  { %v3513_v34 = vpop.eup %3512 }
0x14c8   :  { %2117 = vrot.lane.b32.xlu0 %v3513_v34, %s3539_s2 }
0x14e0   :  { %v2289_v44 = vpop.permute.xlu1 %2288 }
0x14e1   :  { %v2291_v45 = vadd.f32 %v2289_v44, %v2281_v37 }
0x14e3   :  { %3514 = vtanh.f32 %v2291_v45 }
0x14e4   :  { %3516 = vpow2.f32 %v2724_v54  ;;  %v2596_v54 = vld [vmem:[%s4436_s9 + $0x8] sm:$0xff] }
0x14ed   :  { %v3515_v53 = vpop.eup %3514 }
0x14ee   :  { %2294 = vrot.lane.b32.xlu1 %v3515_v53, %s3539_s2  ;;  %v3517_v60 = vpop.eup %3516  ;;  %v2595_v53 = vld [vmem:[%s4436_s9] sm:$0xff] }
0x14ef   :  { %v2098_v61 = vadd.f32 1.0, %v3517_v60  ;;  %v3322_v60 = vpack.c.bf16 %v2596_v54, %v2595_v53 }
0x14f1   :  { %3518 = vrcp.f32 %v2098_v61  ;;  %v16_v61 = vstv %s4437_s10 }
0x14f2   :  { %3520 = vpow2.f32 %v2728_v18  ;;  %17 = vst [vmem:[#allocation6] sm:$0x1] %v16_v61 }
0x14fb   :  { %v3519_v5 = vpop.eup %3518 }
0x14fc   :  { %v3521_v19 = vpop.eup %3520 }
0x14fd   :  { %v2275_v43 = vadd.f32 1.0, %v3521_v19  ;;  %v2735_v19 = vld [vmem:[#allocation6] ss:$0 sm:$0xff] }
0x14ff   :  { %3522 = vrcp.f32 %v2275_v43 }
0x1509   :  { %v3523_v49 = vpop.eup %3522 }
0x153a   :  { %v2118_v6 = vpop.permute.xlu0 %2117 }
0x153b   :  { %v2120_v12 = vmul.f32 %v3519_v5, %v2118_v6  ;;  %v2733_v5 = vld [vmem:[%s4438_s8] ss:$0 sm:$0xff] }
0x153d   :  { %2299 = vrot.lane.b32.xlu0 %v2120_v12, %s3539_s2 }
0x1560   :  { %v2295_v22 = vpop.permute.xlu1 %2294 }
0x1561   :  { %v2297_v28 = vmul.f32 %v3523_v49, %v2295_v22 }
0x15af   :  { %v2300_v32 = vpop.permute.xlu0 %2299 }
0x15b0   :  { %v2302_v39 = vsel %vm45_vm1, %v2297_v28, %v2300_v32 }
0x15b1   :  { %2368 = vmatmul.mubr.f32.vlgmr.msra.gmra.mrb[14].mxu0 %v2302_v39 }
0x15b2   :  { %2770 = vmatprep.mubr.msk.f32.mxu0 %vm3541_vm2, %v3538_v3 }
0x1684   :  { %v2369_v2 = vpop.f32.mrb[14].mxu0 }
0x1685   :  { %v2371_v1 = vpop.f32.mrb[15].mxu0  ;;  %v2370_v56 = vadd.f32 %v2369_v2, %v4002_v11  ;;  %v2421_v11 = vld [vmem:[%s4433_s5 + $0x8] sm:$0xff] }
0x1686   :  { %v2372_v57 = vadd.f32 %v2371_v1, %v3997_v55  ;;  %v2420_v55 = vld [vmem:[%s4433_s5] sm:$0xff] }
0x1687   :  { %v2729_v33 = vmul.f32 -1.442695, %v2370_v56  ;;  %v3304_v4 = vpack.c.bf16 %v2421_v11, %v2420_v55 }
0x1688   :  { %3524 = vtanh.f32 %v2372_v57  ;;  %v2730_v47 = vmul.f32 -1.442695, %v2372_v57 }
0x1689   :  { %3526 = vpow2.f32 %v2729_v33  ;;  %3305 = vmatpush3.bf16.msra.mxu0 %v3304_v4 }
0x168a   :  { %3306 = vmatprep.subr.bf16.mxu0 %v3540_v63 }
0x168d   :  { %3308 = vmatpush3.bf16.msra.mxu0 %v3307_v23 }
0x168e   :  { %3309 = vmatprep.subr.bf16.mxu0 %v3540_v63 }
0x1691   :  { %3311 = vmatpush3.bf16.msra.mxu0 %v3310_v15 }
0x1692   :  { %v3525_v40 = vpop.eup %3524  ;;  %3312 = vmatprep.subr.bf16.mxu0 %v3540_v63 }
0x1693   :  { %2389 = vrot.lane.b32.xlu1 %v3525_v40, %s3539_s2  ;;  %v3527_v50 = vpop.eup %3526 }
0x1694   :  { %v2380_v58 = vadd.f32 1.0, %v3527_v50 }
0x1695   :  { %3314 = vmatpush3.bf16.msra.mxu0 %v3313_v30 }
0x1696   :  { %3528 = vrcp.f32 %v2380_v58 }
0x16a0   :  { %v3529_v0 = vpop.eup %3528 }
0x16a1   :  { %v2387_v62 = vmul.f32 %v3529_v0, %v2114_v25  ;;  %v2731_v25 = vld [vmem:[%s4435_s6] ss:$0 sm:$0xff] }
0x1705   :  { %v2390_v31 = vpop.permute.xlu1 %2389 }
0x1706   :  { %v2392_v26 = vmul.f32 %v3529_v0, %v2390_v31 }
0x1708   :  { %2394 = vrot.lane.b32.xlu0 %v2392_v26, %s3539_s2 }
0x170c   :  { %2407 = vrot.lane.b32.xlu0 %v2291_v45, %s3539_s2 }
0x177a   :  { %v2395_v7 = vpop.permute.xlu0 %2394 }
0x177b   :  { %v2397_v8 = vadd.f32 %v2395_v7, %v2387_v62 }
0x177d   :  { %3530 = vtanh.f32 %v2397_v8 }
0x177e   :  { %v2408_v20 = vpop.permute.xlu0 %2407  ;;  %3532 = vpow2.f32 %v2730_v47 }
0x177f   :  { %2410 = vst.msk [vmem:[#allocation4] sm:$0xff] %vm45_vm1, %v2408_v20 }
0x1787   :  { %v3531_v41 = vpop.eup %3530 }
0x1788   :  { %2400 = vrot.lane.b32.xlu1 %v3531_v41, %s3539_s2  ;;  %v3533_v48 = vpop.eup %3532 }
0x1789   :  { %v2381_v51 = vadd.f32 1.0, %v3533_v48 }
0x178b   :  { %3534 = vrcp.f32 %v2381_v51 }
0x178c   :  { %2412 = vrot.lane.b32.xlu1 %v2397_v8, %s3539_s2 }
0x1795   :  { %v3535_v13 = vpop.eup %3534 }
0x17fa   :  { %v2401_v59 = vpop.permute.xlu1 %2400 }
0x17fb   :  { %v2403_v46 = vmul.f32 %v3535_v13, %v2401_v59 }
0x17fd   :  { %2405 = vst.msk [vmem:[#allocation3] sm:$0xff] %vm45_vm1, %v2403_v46 }
0x17fe   :  { %v2413_v52 = vpop.permute.xlu1 %2412 }
0x17ff   :  { %2415 = vst.msk [vmem:[#allocation5] sm:$0xff] %vm45_vm1, %v2413_v52 }
0x1804   :  { %v2419_v10 = vld [vmem:[#allocation3] sm:$0xff] }
0x1805   :  { %2771 = vmatmul.mubr.msk.f32.vlgmr.msra.gmra.mrb[16].mxu0 %vm45_vm1, %v2419_v10 }
0x18d8   :  { %v2504_v34 = vpop.f32.mrb[16].mxu0 }
0x18d9   :  { %v2505_v37 = vadd.f32 %v2731_v25, %v2504_v34  ;;  %v2772_v44 = vpop.f32.mrb[17].mxu0 }
0x18db   :  { %v2508_v45 = vmax.f32 %v2505_v37, 0.0 }
0x18dd   :  { %2782 = vmatmul.mubr.msk.f32.vlgmr.msra.gmra.mrb[18].mxu1 %vm2520_vm3, %v2508_v45 }
0x18de   :  { %2788 = vmatprep.mubr.msk.f32.mxu1 %vm3541_vm2, %v3538_v3  ;;  %3323 = vmatpush3.bf16.msra.mxu1 %v3322_v60 }
0x19b0   :  { %v2590_v3 = vpop.f32.mrb[18].mxu1 }
0x19b1   :  { %v2591_v6 = vadd.f32 %v2733_v5, %v2590_v3  ;;  %v2783_v12 = vpop.f32.mrb[19].mxu1 }
0x19b3   :  { %v2594_v18 = vmax.f32 %v2591_v6, 0.0 }
0x19b5   :  { %2789 = vmatmul.mubr.msk.f32.vlgmr.msra.gmra.mrb[20].mxu1 %vm2604_vm4, %v2594_v18 }
0x1a88   :  { %v2674_v43 = vpop.f32.mrb[20].mxu1 }
0x1a89   :  { %v2675_v22 = vadd.f32 %v2735_v19, %v2674_v43  ;;  %v2790_v49 = vpop.f32.mrb[21].mxu1 }
0x1a8b   :  { %2679 = vst.msk [vmem:[%s4439_s11] sm:$0xff] %vm2678_vm5, %v2675_v22 }

</bundles_post_ra>
